<compile_context>
chip_gen: v7x
topology: tpu7x:2x2x1
jax: 0.10.0
libtpu: 0.0.40
codegen_flags: <defaults>
</compile_context>

<pallas_src>
import jax
import jax.numpy as jnp
import numpy as np
from jax.experimental import pallas as pl
from jax.experimental.pallas import tpu as pltpu


def _round_up(x, m):
    return (x + m - 1) // m * m


def _vmem_need_bytes(th, W, Wv, Wp, Cp):
    in_tile = (th + 2) * Wp * Cp * 2     # bf16 padded input tile
    out_tile = th * W * Cp * 4           # f32 output tile
    weights = 9 * Cp * Cp * 2            # bf16 folded weights (resident across grid)
    acc = th * Wv * Cp * 4               # f32 accumulator scratch
    shift = Cp * 4
    return 2 * (in_tile + out_tile) + weights + acc + shift   # x2 = double buffering


def _pick_row_tile(H, W, Wv, Wp, Cp, budget_bytes=6 * 1024 * 1024):
    """Largest row-tile TH dividing H (<= 32) that keeps the working set in budget."""
    cap = max(1, min(32, H // 2))
    for th in range(cap, 0, -1):
        if H % th == 0 and _vmem_need_bytes(th, W, Wv, Wp, Cp) <= budget_bytes:
            return th
    return 1


def _resblock_kernel(x_ref, w_ref, shift_ref, out_ref, acc_ref):
    # x_ref    : (TH+2, Wp, Cp)  bf16  padded input tile (row halo included)
    # w_ref    : (9, Cp, Cp)     bf16  BN-scale-folded 3x3 taps, index = ky*3 + kx
    # shift_ref: (1, Cp)         f32   BN shift (beta - mean*scale), zero in padded lanes
    # out_ref  : (TH, W, Cp)     f32
    # acc_ref  : (TH*Wv, Cp)     f32   VMEM accumulator scratch
    THp2, Wp, Cp = x_ref.shape
    TH = THp2 - 2
    W = out_ref.shape[1]
    Wv = acc_ref.shape[0] // TH

    # 3x3 conv as 9 MXU matmuls on the resident tile.
    # dx: one column-shifted view per dx (dx=0 is aligned/free); dy: free leading-dim slice.
    for dx in range(3):
        cols = x_ref[:, dx:dx + Wv, :]                    # (TH+2, Wv, Cp)
        for dy in range(3):
            patch = cols[dy:dy + TH].reshape(TH * Wv, Cp)  # Wv % 8 == 0 -> layout-free reshape
            contrib = jnp.dot(patch, w_ref[dy * 3 + dx],
                              preferred_element_type=jnp.float32)
            if dx == 0 and dy == 0:
                acc_ref[...] = contrib                     # first tap initializes
            else:
                acc_ref[...] += contrib

    # Epilogue (f32): + BN shift (scale already folded into weights) + residual + ReLU.
    conv = acc_ref[...].reshape(TH, Wv, Cp)[:, :W, :]      # drop right-pad columns
    identity = x_ref[1:TH + 1, 1:W + 1, :].astype(jnp.float32)  # residual from resident tile
    out_ref[...] = jnp.maximum(conv + shift_ref[...] + identity, 0.0)


@jax.jit
def basic_res_block_conv1(x_nchw, conv_w, gamma, beta, run_mean, run_var, eps=1e-5):
    """x_nchw: (N, C, H, W) f32; conv_w: (C, C, 3, 3) f32; BN params: (C,) f32."""
    N, C, H, W = x_nchw.shape
    Cout, Cin, KH, KW = conv_w.shape
    assert (KH, KW) == (3, 3)
    assert Cin == C and Cout == C, "no-downsample residual needs inplanes == planes"

    Cp = _round_up(C, 128)        # lane-dense channels
    Wv = _round_up(W, 8)          # sublane-aligned valid width used inside the kernel
    Wp = Wv + 8                   # padded width: 1 left halo + >=1 right halo + alignment
    TH = _pick_row_tile(H, W, Wv, Wp, Cp)
    T = H // TH

    # ---- parameter prep: fold BN scale into the conv weights ----
    scale = gamma / jnp.sqrt(run_var + eps)                        # (C,)
    shift = (beta - run_mean * scale).astype(jnp.float32)          # (C,)
    w_f = conv_w * scale[:, None, None, None]
    w_taps = jnp.transpose(w_f, (2, 3, 1, 0)).reshape(9, C, C)     # (ky,kx,Cin,Cout) tap-major
    w_taps = jnp.pad(w_taps, ((0, 0), (0, Cp - C), (0, Cp - C))).astype(jnp.bfloat16)
    shift_p = jnp.pad(shift, (0, Cp - C)).reshape(1, Cp)

    # ---- activation prep: NCHW -> NHWC, spatial+channel pad, bf16, overlapping row tiles ----
    x_nhwc = jnp.transpose(x_nchw, (0, 2, 3, 1))
    xp = jnp.pad(x_nhwc,
                 ((0, 0), (1, 1), (1, Wp - W - 1), (0, Cp - C))).astype(jnp.bfloat16)
    row_idx = jnp.arange(T)[:, None] * TH + jnp.arange(TH + 2)[None, :]   # (T, TH+2)
    x_tiles = xp[:, row_idx]                                       # (N, T, TH+2, Wp, Cp)
    # TODO(synk): with pl.Element halo indexing (or an end-to-end NHWC pipeline) the
    # transpose / pad / halo-duplication HBM passes above could be removed entirely.

    vmem_limit = int(min(max(2 * _vmem_need_bytes(TH, W, Wv, Wp, Cp),
                             16 * 1024 * 1024), 32 * 1024 * 1024))

    out_p = pl.pallas_call(
        _resblock_kernel,
        out_shape=jax.ShapeDtypeStruct((N, H, W, Cp), jnp.float32),
        grid_spec=pltpu.PrefetchScalarGridSpec(
            num_scalar_prefetch=0,
            grid=(N, T),
            in_specs=[
                pl.BlockSpec((None, None, TH + 2, Wp, Cp),
                             lambda n, t: (n, t, 0, 0, 0)),
                pl.BlockSpec((9, Cp, Cp), lambda n, t: (0, 0, 0)),   # resident (const index)
                pl.BlockSpec((1, Cp), lambda n, t: (0, 0)),
            ],
            out_specs=pl.BlockSpec((None, TH, W, Cp), lambda n, t: (n, t, 0, 0)),
            scratch_shapes=[pltpu.VMEM((TH * Wv, Cp), jnp.float32)],
        ),
        compiler_params=pltpu.CompilerParams(
            dimension_semantics=("parallel", "parallel"),
            vmem_limit_bytes=vmem_limit,
        ),
    )(x_tiles, w_taps, shift_p)

    # Drop channel padding and return to NCHW (fused by XLA with the transpose).
    return jnp.transpose(out_p[..., :C], (0, 3, 1, 2))


def _reference(x_nchw, conv_w, gamma, beta, run_mean, run_var, eps=1e-5):
    """Pure-JAX f32 reference (NCHW conv + eval BN + residual + ReLU)."""
    out = jax.lax.conv_general_dilated(
        x_nchw, conv_w, window_strides=(1, 1), padding=((1, 1), (1, 1)),
        dimension_numbers=("NCHW", "OIHW", "NCHW"),
        precision=jax.lax.Precision.HIGHEST)
    scale = gamma / jnp.sqrt(run_var + eps)
    shift = beta - run_mean * scale
    out = out * scale[None, :, None, None] + shift[None, :, None, None]
    out = out + x_nchw
    return jnp.maximum(out, 0.0)


if __name__ == "__main__":
    key = jax.random.PRNGKey(0)
    k_x, k_w, k_g, k_b, k_m, k_v = jax.random.split(key, 6)

    N, C, H, W = 2, 4, 16, 16          # inplanes = planes = 4, stride 1, no downsample
    x = jax.random.normal(k_x, (N, C, H, W), dtype=jnp.float32)
    conv_w = jax.random.normal(k_w, (C, C, 3, 3), dtype=jnp.float32) * 0.1
    gamma = 1.0 + 0.1 * jax.random.normal(k_g, (C,), dtype=jnp.float32)
    beta = 0.1 * jax.random.normal(k_b, (C,), dtype=jnp.float32)
    run_mean = 0.1 * jax.random.normal(k_m, (C,), dtype=jnp.float32)
    run_var = 1.0 + 0.1 * jax.random.uniform(k_v, (C,), dtype=jnp.float32)

    # The kernel computes the conv / residual in bf16 (f32 accumulate). Quantize the
    # activations once so the check isolates kernel correctness from bf16 input rounding.
    x_q = x.astype(jnp.bfloat16).astype(jnp.float32)

    out = basic_res_block_conv1(x_q, conv_w, gamma, beta, run_mean, run_var)
    out = jax.block_until_ready(out)

    ref = _reference(x_q, conv_w, gamma, beta, run_mean, run_var)
    np.testing.assert_allclose(np.asarray(out), np.asarray(ref), rtol=5e-2, atol=5e-2)
    print("KERNEL_OK")
</pallas_src>

<mosaic_0001>
module attributes {stable_mosaic.version = 11 : i64} {
  func.func @_resblock_kernel(%arg0: i32, %arg1: i32, %arg2: memref<1x1x10x24x128xbf16, #tpu.memory_space<vmem>>, %arg3: memref<9x128x128xbf16, #tpu.memory_space<vmem>>, %arg4: memref<1x128xf32, #tpu.memory_space<vmem>>, %arg5: memref<1x8x16x128xf32, #tpu.memory_space<vmem>>, %arg6: memref<128x128xf32, #tpu.memory_space<vmem>>) attributes {dimension_semantics = [#tpu.dimension_semantics<parallel>, #tpu.dimension_semantics<parallel>], iteration_bounds = array<i64: 2, 2>, scalar_prefetch = 0 : i64, scratch_operands = 1 : i64, tpu.core_type = #tpu.core_type<tc>, window_params = [{transform_indices = @transform_0, window_bounds = array<i64: 1, 1, 10, 24, 128>}, {pipeline_mode = #tpu.pipeline_mode<synchronous>, transform_indices = @transform_1, window_bounds = array<i64: 9, 128, 128>}, {pipeline_mode = #tpu.pipeline_mode<synchronous>, transform_indices = @transform_2, window_bounds = array<i64: 1, 128>}, {transform_indices = @transform_3, window_bounds = array<i64: 1, 8, 16, 128>}]} {
    %c0 = arith.constant 0 : index
    %c0_0 = arith.constant 0 : index
    %c0_1 = arith.constant 0 : index
    %c0_2 = arith.constant 0 : index
    %c0_3 = arith.constant 0 : index
    %0 = vector.load %arg2[%c0, %c0_0, %c0_1, %c0_2, %c0_3] : memref<1x1x10x24x128xbf16, #tpu.memory_space<vmem>>, vector<1x1x10x16x128xbf16>
    %1 = vector.shape_cast %0 : vector<1x1x10x16x128xbf16> to vector<10x16x128xbf16>
    %2 = vector.extract_strided_slice %1 {offsets = [0, 0, 0], sizes = [8, 16, 128], strides = [1, 1, 1]} : vector<10x16x128xbf16> to vector<8x16x128xbf16>
    %3 = vector.shape_cast %2 : vector<8x16x128xbf16> to vector<128x128xbf16>
    %c0_4 = arith.constant 0 : index
    %c0_5 = arith.constant 0 : index
    %c0_6 = arith.constant 0 : index
    %4 = vector.load %arg3[%c0_4, %c0_5, %c0_6] : memref<9x128x128xbf16, #tpu.memory_space<vmem>>, vector<1x128x128xbf16>
    %5 = vector.shape_cast %4 : vector<1x128x128xbf16> to vector<128x128xbf16>
    %cst = arith.constant dense<0.000000e+00> : vector<128x128xf32>
    %6 = tpu.matmul %3, %5, %cst {dimension_numbers = #tpu.dot_dimension_numbers<[1], [0], [0], [1], [0, 0, 1, 1], [], []>} : vector<128x128xbf16>, vector<128x128xbf16>, vector<128x128xf32> -> vector<128x128xf32>
    %c0_7 = arith.constant 0 : index
    %c0_8 = arith.constant 0 : index
    %7 = vector.load %arg6[%c0_7, %c0_8] : memref<128x128xf32, #tpu.memory_space<vmem>>, vector<128x128xf32>
    tpu.vector_store %arg6[%c0_7, %c0_8], %6 {strides = array<i32>} : memref<128x128xf32, #tpu.memory_space<vmem>>, vector<128x128xf32>,
    %8 = vector.extract_strided_slice %1 {offsets = [1, 0, 0], sizes = [8, 16, 128], strides = [1, 1, 1]} : vector<10x16x128xbf16> to vector<8x16x128xbf16>
    %9 = vector.shape_cast %8 : vector<8x16x128xbf16> to vector<128x128xbf16>
    %c3 = arith.constant 3 : index
    %c0_9 = arith.constant 0 : index
    %c0_10 = arith.constant 0 : index
    %10 = vector.load %arg3[%c3, %c0_9, %c0_10] : memref<9x128x128xbf16, #tpu.memory_space<vmem>>, vector<1x128x128xbf16>
    %11 = vector.shape_cast %10 : vector<1x128x128xbf16> to vector<128x128xbf16>
    %cst_11 = arith.constant dense<0.000000e+00> : vector<128x128xf32>
    %12 = tpu.matmul %9, %11, %cst_11 {dimension_numbers = #tpu.dot_dimension_numbers<[1], [0], [0], [1], [0, 0, 1, 1], [], []>} : vector<128x128xbf16>, vector<128x128xbf16>, vector<128x128xf32> -> vector<128x128xf32>
    %c0_12 = arith.constant 0 : index
    %c0_13 = arith.constant 0 : index
    %13 = vector.load %arg6[%c0_12, %c0_13] : memref<128x128xf32, #tpu.memory_space<vmem>>, vector<128x128xf32>
    %14 = arith.addf %13, %12 : vector<128x128xf32>
    %c0_14 = arith.constant 0 : index
    %c0_15 = arith.constant 0 : index
    %15 = vector.load %arg6[%c0_14, %c0_15] : memref<128x128xf32, #tpu.memory_space<vmem>>, vector<128x128xf32>
    tpu.vector_store %arg6[%c0_14, %c0_15], %14 {strides = array<i32>} : memref<128x128xf32, #tpu.memory_space<vmem>>, vector<128x128xf32>,
    %16 = vector.extract_strided_slice %1 {offsets = [2, 0, 0], sizes = [8, 16, 128], strides = [1, 1, 1]} : vector<10x16x128xbf16> to vector<8x16x128xbf16>
    %17 = vector.shape_cast %16 : vector<8x16x128xbf16> to vector<128x128xbf16>
    %c6 = arith.constant 6 : index
    %c0_16 = arith.constant 0 : index
    %c0_17 = arith.constant 0 : index
    %18 = vector.load %arg3[%c6, %c0_16, %c0_17] : memref<9x128x128xbf16, #tpu.memory_space<vmem>>, vector<1x128x128xbf16>
    %19 = vector.shape_cast %18 : vector<1x128x128xbf16> to vector<128x128xbf16>
    %cst_18 = arith.constant dense<0.000000e+00> : vector<128x128xf32>
    %20 = tpu.matmul %17, %19, %cst_18 {dimension_numbers = #tpu.dot_dimension_numbers<[1], [0], [0], [1], [0, 0, 1, 1], [], []>} : vector<128x128xbf16>, vector<128x128xbf16>, vector<128x128xf32> -> vector<128x128xf32>
    %c0_19 = arith.constant 0 : index
    %c0_20 = arith.constant 0 : index
    %21 = vector.load %arg6[%c0_19, %c0_20] : memref<128x128xf32, #tpu.memory_space<vmem>>, vector<128x128xf32>
    %22 = arith.addf %21, %20 : vector<128x128xf32>
    %c0_21 = arith.constant 0 : index
    %c0_22 = arith.constant 0 : index
    %23 = vector.load %arg6[%c0_21, %c0_22] : memref<128x128xf32, #tpu.memory_space<vmem>>, vector<128x128xf32>
    tpu.vector_store %arg6[%c0_21, %c0_22], %22 {strides = array<i32>} : memref<128x128xf32, #tpu.memory_space<vmem>>, vector<128x128xf32>,
    %c0_23 = arith.constant 0 : index
    %c0_24 = arith.constant 0 : index
    %c0_25 = arith.constant 0 : index
    %c1 = arith.constant 1 : index
    %c0_26 = arith.constant 0 : index
    %24 = vector.load %arg2[%c0_23, %c0_24, %c0_25, %c1, %c0_26] : memref<1x1x10x24x128xbf16, #tpu.memory_space<vmem>>, vector<1x1x10x16x128xbf16>
    %25 = vector.shape_cast %24 : vector<1x1x10x16x128xbf16> to vector<10x16x128xbf16>
    %26 = vector.extract_strided_slice %25 {offsets = [0, 0, 0], sizes = [8, 16, 128], strides = [1, 1, 1]} : vector<10x16x128xbf16> to vector<8x16x128xbf16>
    %27 = vector.shape_cast %26 : vector<8x16x128xbf16> to vector<128x128xbf16>
    %c1_27 = arith.constant 1 : index
    %c0_28 = arith.constant 0 : index
    %c0_29 = arith.constant 0 : index
    %28 = vector.load %arg3[%c1_27, %c0_28, %c0_29] : memref<9x128x128xbf16, #tpu.memory_space<vmem>>, vector<1x128x128xbf16>
    %29 = vector.shape_cast %28 : vector<1x128x128xbf16> to vector<128x128xbf16>
    %cst_30 = arith.constant dense<0.000000e+00> : vector<128x128xf32>
    %30 = tpu.matmul %27, %29, %cst_30 {dimension_numbers = #tpu.dot_dimension_numbers<[1], [0], [0], [1], [0, 0, 1, 1], [], []>} : vector<128x128xbf16>, vector<128x128xbf16>, vector<128x128xf32> -> vector<128x128xf32>
    %c0_31 = arith.constant 0 : index
    %c0_32 = arith.constant 0 : index
    %31 = vector.load %arg6[%c0_31, %c0_32] : memref<128x128xf32, #tpu.memory_space<vmem>>, vector<128x128xf32>
    %32 = arith.addf %31, %30 : vector<128x128xf32>
    %c0_33 = arith.constant 0 : index
    %c0_34 = arith.constant 0 : index
    %33 = vector.load %arg6[%c0_33, %c0_34] : memref<128x128xf32, #tpu.memory_space<vmem>>, vector<128x128xf32>
    tpu.vector_store %arg6[%c0_33, %c0_34], %32 {strides = array<i32>} : memref<128x128xf32, #tpu.memory_space<vmem>>, vector<128x128xf32>,
    %34 = vector.extract_strided_slice %25 {offsets = [1, 0, 0], sizes = [8, 16, 128], strides = [1, 1, 1]} : vector<10x16x128xbf16> to vector<8x16x128xbf16>
    %35 = vector.shape_cast %34 : vector<8x16x128xbf16> to vector<128x128xbf16>
    %c4 = arith.constant 4 : index
    %c0_35 = arith.constant 0 : index
    %c0_36 = arith.constant 0 : index
    %36 = vector.load %arg3[%c4, %c0_35, %c0_36] : memref<9x128x128xbf16, #tpu.memory_space<vmem>>, vector<1x128x128xbf16>
    %37 = vector.shape_cast %36 : vector<1x128x128xbf16> to vector<128x128xbf16>
    %cst_37 = arith.constant dense<0.000000e+00> : vector<128x128xf32>
    %38 = tpu.matmul %35, %37, %cst_37 {dimension_numbers = #tpu.dot_dimension_numbers<[1], [0], [0], [1], [0, 0, 1, 1], [], []>} : vector<128x128xbf16>, vector<128x128xbf16>, vector<128x128xf32> -> vector<128x128xf32>
    %c0_38 = arith.constant 0 : index
    %c0_39 = arith.constant 0 : index
    %39 = vector.load %arg6[%c0_38, %c0_39] : memref<128x128xf32, #tpu.memory_space<vmem>>, vector<128x128xf32>
    %40 = arith.addf %39, %38 : vector<128x128xf32>
    %c0_40 = arith.constant 0 : index
    %c0_41 = arith.constant 0 : index
    %41 = vector.load %arg6[%c0_40, %c0_41] : memref<128x128xf32, #tpu.memory_space<vmem>>, vector<128x128xf32>
    tpu.vector_store %arg6[%c0_40, %c0_41], %40 {strides = array<i32>} : memref<128x128xf32, #tpu.memory_space<vmem>>, vector<128x128xf32>,
    %42 = vector.extract_strided_slice %25 {offsets = [2, 0, 0], sizes = [8, 16, 128], strides = [1, 1, 1]} : vector<10x16x128xbf16> to vector<8x16x128xbf16>
    %43 = vector.shape_cast %42 : vector<8x16x128xbf16> to vector<128x128xbf16>
    %c7 = arith.constant 7 : index
    %c0_42 = arith.constant 0 : index
    %c0_43 = arith.constant 0 : index
    %44 = vector.load %arg3[%c7, %c0_42, %c0_43] : memref<9x128x128xbf16, #tpu.memory_space<vmem>>, vector<1x128x128xbf16>
    %45 = vector.shape_cast %44 : vector<1x128x128xbf16> to vector<128x128xbf16>
    %cst_44 = arith.constant dense<0.000000e+00> : vector<128x128xf32>
    %46 = tpu.matmul %43, %45, %cst_44 {dimension_numbers = #tpu.dot_dimension_numbers<[1], [0], [0], [1], [0, 0, 1, 1], [], []>} : vector<128x128xbf16>, vector<128x128xbf16>, vector<128x128xf32> -> vector<128x128xf32>
    %c0_45 = arith.constant 0 : index
    %c0_46 = arith.constant 0 : index
    %47 = vector.load %arg6[%c0_45, %c0_46] : memref<128x128xf32, #tpu.memory_space<vmem>>, vector<128x128xf32>
    %48 = arith.addf %47, %46 : vector<128x128xf32>
    %c0_47 = arith.constant 0 : index
    %c0_48 = arith.constant 0 : index
    %49 = vector.load %arg6[%c0_47, %c0_48] : memref<128x128xf32, #tpu.memory_space<vmem>>, vector<128x128xf32>
    tpu.vector_store %arg6[%c0_47, %c0_48], %48 {strides = array<i32>} : memref<128x128xf32, #tpu.memory_space<vmem>>, vector<128x128xf32>,
    %c0_49 = arith.constant 0 : index
    %c0_50 = arith.constant 0 : index
    %c0_51 = arith.constant 0 : index
    %c2 = arith.constant 2 : index
    %c0_52 = arith.constant 0 : index
    %50 = vector.load %arg2[%c0_49, %c0_50, %c0_51, %c2, %c0_52] : memref<1x1x10x24x128xbf16, #tpu.memory_space<vmem>>, vector<1x1x10x16x128xbf16>
    %51 = vector.shape_cast %50 : vector<1x1x10x16x128xbf16> to vector<10x16x128xbf16>
    %52 = vector.extract_strided_slice %51 {offsets = [0, 0, 0], sizes = [8, 16, 128], strides = [1, 1, 1]} : vector<10x16x128xbf16> to vector<8x16x128xbf16>
    %53 = vector.shape_cast %52 : vector<8x16x128xbf16> to vector<128x128xbf16>
    %c2_53 = arith.constant 2 : index
    %c0_54 = arith.constant 0 : index
    %c0_55 = arith.constant 0 : index
    %54 = vector.load %arg3[%c2_53, %c0_54, %c0_55] : memref<9x128x128xbf16, #tpu.memory_space<vmem>>, vector<1x128x128xbf16>
    %55 = vector.shape_cast %54 : vector<1x128x128xbf16> to vector<128x128xbf16>
    %cst_56 = arith.constant dense<0.000000e+00> : vector<128x128xf32>
    %56 = tpu.matmul %53, %55, %cst_56 {dimension_numbers = #tpu.dot_dimension_numbers<[1], [0], [0], [1], [0, 0, 1, 1], [], []>} : vector<128x128xbf16>, vector<128x128xbf16>, vector<128x128xf32> -> vector<128x128xf32>
    %c0_57 = arith.constant 0 : index
    %c0_58 = arith.constant 0 : index
    %57 = vector.load %arg6[%c0_57, %c0_58] : memref<128x128xf32, #tpu.memory_space<vmem>>, vector<128x128xf32>
    %58 = arith.addf %57, %56 : vector<128x128xf32>
    %c0_59 = arith.constant 0 : index
    %c0_60 = arith.constant 0 : index
    %59 = vector.load %arg6[%c0_59, %c0_60] : memref<128x128xf32, #tpu.memory_space<vmem>>, vector<128x128xf32>
    tpu.vector_store %arg6[%c0_59, %c0_60], %58 {strides = array<i32>} : memref<128x128xf32, #tpu.memory_space<vmem>>, vector<128x128xf32>,
    %60 = vector.extract_strided_slice %51 {offsets = [1, 0, 0], sizes = [8, 16, 128], strides = [1, 1, 1]} : vector<10x16x128xbf16> to vector<8x16x128xbf16>
    %61 = vector.shape_cast %60 : vector<8x16x128xbf16> to vector<128x128xbf16>
    %c5 = arith.constant 5 : index
    %c0_61 = arith.constant 0 : index
    %c0_62 = arith.constant 0 : index
    %62 = vector.load %arg3[%c5, %c0_61, %c0_62] : memref<9x128x128xbf16, #tpu.memory_space<vmem>>, vector<1x128x128xbf16>
    %63 = vector.shape_cast %62 : vector<1x128x128xbf16> to vector<128x128xbf16>
    %cst_63 = arith.constant dense<0.000000e+00> : vector<128x128xf32>
    %64 = tpu.matmul %61, %63, %cst_63 {dimension_numbers = #tpu.dot_dimension_numbers<[1], [0], [0], [1], [0, 0, 1, 1], [], []>} : vector<128x128xbf16>, vector<128x128xbf16>, vector<128x128xf32> -> vector<128x128xf32>
    %c0_64 = arith.constant 0 : index
    %c0_65 = arith.constant 0 : index
    %65 = vector.load %arg6[%c0_64, %c0_65] : memref<128x128xf32, #tpu.memory_space<vmem>>, vector<128x128xf32>
    %66 = arith.addf %65, %64 : vector<128x128xf32>
    %c0_66 = arith.constant 0 : index
    %c0_67 = arith.constant 0 : index
    %67 = vector.load %arg6[%c0_66, %c0_67] : memref<128x128xf32, #tpu.memory_space<vmem>>, vector<128x128xf32>
    tpu.vector_store %arg6[%c0_66, %c0_67], %66 {strides = array<i32>} : memref<128x128xf32, #tpu.memory_space<vmem>>, vector<128x128xf32>,
    %68 = vector.extract_strided_slice %51 {offsets = [2, 0, 0], sizes = [8, 16, 128], strides = [1, 1, 1]} : vector<10x16x128xbf16> to vector<8x16x128xbf16>
    %69 = vector.shape_cast %68 : vector<8x16x128xbf16> to vector<128x128xbf16>
    %c8 = arith.constant 8 : index
    %c0_68 = arith.constant 0 : index
    %c0_69 = arith.constant 0 : index
    %70 = vector.load %arg3[%c8, %c0_68, %c0_69] : memref<9x128x128xbf16, #tpu.memory_space<vmem>>, vector<1x128x128xbf16>
    %71 = vector.shape_cast %70 : vector<1x128x128xbf16> to vector<128x128xbf16>
    %cst_70 = arith.constant dense<0.000000e+00> : vector<128x128xf32>
    %72 = tpu.matmul %69, %71, %cst_70 {dimension_numbers = #tpu.dot_dimension_numbers<[1], [0], [0], [1], [0, 0, 1, 1], [], []>} : vector<128x128xbf16>, vector<128x128xbf16>, vector<128x128xf32> -> vector<128x128xf32>
    %c0_71 = arith.constant 0 : index
    %c0_72 = arith.constant 0 : index
    %73 = vector.load %arg6[%c0_71, %c0_72] : memref<128x128xf32, #tpu.memory_space<vmem>>, vector<128x128xf32>
    %74 = arith.addf %73, %72 : vector<128x128xf32>
    %c0_73 = arith.constant 0 : index
    %c0_74 = arith.constant 0 : index
    %75 = vector.load %arg6[%c0_73, %c0_74] : memref<128x128xf32, #tpu.memory_space<vmem>>, vector<128x128xf32>
    tpu.vector_store %arg6[%c0_73, %c0_74], %74 {strides = array<i32>} : memref<128x128xf32, #tpu.memory_space<vmem>>, vector<128x128xf32>,
    %c0_75 = arith.constant 0 : index
    %c0_76 = arith.constant 0 : index
    %76 = vector.load %arg6[%c0_75, %c0_76] : memref<128x128xf32, #tpu.memory_space<vmem>>, vector<128x128xf32>
    %77 = vector.shape_cast %76 : vector<128x128xf32> to vector<8x16x128xf32>
    %c0_77 = arith.constant 0 : index
    %c0_78 = arith.constant 0 : index
    %c1_79 = arith.constant 1 : index
    %c1_80 = arith.constant 1 : index
    %c0_81 = arith.constant 0 : index
    %78 = vector.load %arg2[%c0_77, %c0_78, %c1_79, %c1_80, %c0_81] : memref<1x1x10x24x128xbf16, #tpu.memory_space<vmem>>, vector<1x1x8x16x128xbf16>
    %79 = vector.shape_cast %78 : vector<1x1x8x16x128xbf16> to vector<8x16x128xbf16>
    %80 = arith.extf %79 : vector<8x16x128xbf16> to vector<8x16x128xf32>
    %c0_82 = arith.constant 0 : index
    %c0_83 = arith.constant 0 : index
    %81 = vector.load %arg4[%c0_82, %c0_83] : memref<1x128xf32, #tpu.memory_space<vmem>>, vector<1x128xf32>
    %82 = vector.shape_cast %81 : vector<1x128xf32> to vector<1x1x128xf32>
    %83 = vector.broadcast %82 : vector<1x1x128xf32> to vector<8x16x128xf32>
    %84 = arith.addf %77, %83 : vector<8x16x128xf32>
    %85 = arith.addf %84, %80 : vector<8x16x128xf32>
    %cst_84 = arith.constant 0.000000e+00 : f32
    %86 = vector.broadcast %cst_84 : f32 to vector<8x16x128xf32>
    %87 = arith.maximumf %85, %86 : vector<8x16x128xf32>
    %c0_85 = arith.constant 0 : index
    %c0_86 = arith.constant 0 : index
    %c0_87 = arith.constant 0 : index
    %c0_88 = arith.constant 0 : index
    %88 = vector.load %arg5[%c0_85, %c0_86, %c0_87, %c0_88] : memref<1x8x16x128xf32, #tpu.memory_space<vmem>>, vector<1x8x16x128xf32>
    %89 = vector.shape_cast %88 : vector<1x8x16x128xf32> to vector<8x16x128xf32>
    %90 = vector.shape_cast %87 : vector<8x16x128xf32> to vector<1x8x16x128xf32>
    tpu.vector_store %arg5[%c0_85, %c0_86, %c0_87, %c0_88], %90 {strides = array<i32>} : memref<1x8x16x128xf32, #tpu.memory_space<vmem>>, vector<1x8x16x128xf32>,
    return
  }
  func.func @transform_0(%arg0: i32, %arg1: i32) -> (i32, i32, i32, i32, i32) {
    %c0_i32 = arith.constant 0 : i32
    %c0_i32_0 = arith.constant 0 : i32
    %c0_i32_1 = arith.constant 0 : i32
    %c0_i32_2 = arith.constant 0 : i32
    return %arg0, %arg1, %c0_i32, %c0_i32_0, %c0_i32_1 : i32, i32, i32, i32, i32
  }
  func.func @transform_1(%arg0: i32, %arg1: i32) -> (i32, i32, i32) {
    %c0_i32 = arith.constant 0 : i32
    %c0_i32_0 = arith.constant 0 : i32
    %c0_i32_1 = arith.constant 0 : i32
    %c0_i32_2 = arith.constant 0 : i32
    return %c0_i32, %c0_i32_0, %c0_i32_1 : i32, i32, i32
  }
  func.func @transform_2(%arg0: i32, %arg1: i32) -> (i32, i32) {
    %c0_i32 = arith.constant 0 : i32
    %c0_i32_0 = arith.constant 0 : i32
    %c0_i32_1 = arith.constant 0 : i32
    return %c0_i32, %c0_i32_0 : i32, i32
  }
  func.func @transform_3(%arg0: i32, %arg1: i32) -> (i32, i32, i32, i32) {
    %c0_i32 = arith.constant 0 : i32
    %c0_i32_0 = arith.constant 0 : i32
    %c0_i32_1 = arith.constant 0 : i32
    return %arg0, %arg1, %c0_i32, %c0_i32_0 : i32, i32, i32, i32
  }
}

</mosaic_0001>

<bundles_post_ra>
// kernel: basic_res_block_conv1.1
= control target key start
LH: loop header
LB: loop body
LE: loop exit
PB: predicated region body
PF: predicated region fallthrough
CT: control target
= control target key end

     0   :  { %s4007_s12 = smov 0   ;;  %s4009_s13 = smov 0   ;;  %s4723_s0 = inlined_call_operand.vmem [shape: bf16[2,2,10,24,128], index: 0, kind: input, shape index: {}]   ;;  %s4724_s1 = inlined_call_operand.vmem [shape: bf16[9,128,128], index: 1, kind: input, shape index: {}]   ;;  %s4725_s2 = inlined_call_operand.vmem [shape: f32[1,128], index: 2, kind: input, shape index: {}]   ;;  %s4726_s3 = inlined_call_operand.vmem [shape: f32[2,16,16,128], index: 3, kind: output, shape index: {}]  }
   0x1   :  { %s4011_s14 = smov 0   ;;  %s4013_s15 = smov 0  }
   0x2   :  { %s4015_s16 = smov 0  }
   0x3 LB: > { %s22_s17 = sadd.s32 1, %s3977_s14  ;;  %s25_s18 = sadd.s32 1, %s3981_s15  ;;  %s3985_s16 = sphi %s4015_s16, %s13_s16   ;;  %s3981_s15 = sphi %s4013_s15, %s4735_s15   ;;  %s3977_s14 = sphi %s4011_s14, %s4734_s14   ;;  %s3973_s13 = sphi %s4009_s13, %s4733_s13   ;;  %s3969_s12 = sphi %s4007_s12, %s4732_s12  }
   0x4   : > { %p23_p0 = scmp.ge.s32.totalorder %s22_s17, 2  ;;  %p2954_p1 = scmp.ge.s32.totalorder %s3985_s16, 1 }
   0x5   : > { %p157_p2 = scmp.lt.s32.totalorder %s3985_s16, 5 }
   0x6   : > { %s4737_s17 = smov (%p23_p0, %s22_s17), 0  ;;  %s4739_s18 = smov (!%p23_p0, %s25_s18), %s3981_s15 }
   0x7   : > { %p158_p3 = pnand %p2954_p1, %p157_p2  ;;  %p27_p4 = scmp.ge.s32.totalorder %s4739_s18, 2 }
   0x8   : > { %v3865_v0 = vld [vmem:[%s4724_s1] sm:$0xff] (!%p158_p3)   ;;  %p190_p5 = scmp.lt.s32.totalorder (!%p158_p3), %s3973_s13, 1  ;;  %p192_p6 = scmp.lt.s32.totalorder (!%p158_p3), %s3969_s12, 1  ;;  %v3867_v2 = vld [vmem:[%s4724_s1 + $0x8] sm:$0xff] (!%p158_p3)   ;;  %v3869_v4 = vld [vmem:[%s4724_s1 + $0x10] sm:$0xff] (!%p158_p3)   ;;  %vm1885_vm3 = vcmask (!%p158_p3), 1042432  }
   0x9   : > { %s4741_s18 = smov (%p27_p4, %s4739_s18), 0  ;;  %161 = sbr.rel (%p158_p3) target bundleno = 410 (0x19a), region = 32 }
   0xa   : > { %v3866_v1 = vld [vmem:[%s4724_s1 + $0x100] sm:$0xff] (!%p158_p3)   ;;  %3391 = vmatprep.subr.bf16.mxu1 (!%p158_p3), %v3865_v0  ;;  %v3868_v3 = vld [vmem:[%s4724_s1 + $0x108] sm:$0xff] (!%p158_p3)   ;;  %v3870_v5 = vld [vmem:[%s4724_s1 + $0x110] sm:$0xff] (!%p158_p3)   ;;  %vm918_vm0 = vsmask.f32 (!%p158_p3), 3328  ;;  %vm1886_vm4 = vcmask (!%p158_p3), 1046532  }
   0xb   : > { %3519 = vmatprep.subr.bf16.mxu0 (!%p158_p3), %v3866_v1  ;;  %3392 = vmatpush3.bf16.msra.mxu1 (!%p158_p3), %v3865_v0  ;;  %v3871_v6 = vld [vmem:[%s4724_s1 + $0x18] sm:$0xff] (!%p158_p3)   ;;  %v3873_v8 = vld [vmem:[%s4724_s1 + $0x20] sm:$0xff] (!%p158_p3)   ;;  %v3875_v10 = vld [vmem:[%s4724_s1 + $0x28] sm:$0xff] (!%p158_p3)   ;;  %vm919_vm1 = vsmask.f32 (!%p158_p3), 7440  ;;  %s2956_s10 = sshll.u32 (!%p158_p3), %s3969_s12, 3 }
   0xc   : > { %3520 = vmatpush3.bf16.msra.mxu0 (!%p158_p3), %v3866_v1  ;;  %3393 = vmatprep.subr.bf16.mxu1 (!%p158_p3), %v3867_v2  ;;  %v3872_v7 = vld [vmem:[%s4724_s1 + $0x118] sm:$0xff] (!%p158_p3)   ;;  %v3874_v9 = vld [vmem:[%s4724_s1 + $0x120] sm:$0xff] (!%p158_p3)   ;;  %v3876_v11 = vld [vmem:[%s4724_s1 + $0x128] sm:$0xff] (!%p158_p3)   ;;  %p4576_p7 = scmp.lt.s32.totalorder (!%p158_p3), %s2956_s10, 15  ;;  %vm2746_vm6 = vcmask (!%p158_p3), 1046528  }
   0xd   : > { %3521 = vmatprep.subr.bf16.mxu0 (!%p158_p3), %v3868_v3  ;;  %v3877_v18 = vld [vmem:[%s4724_s1 + $0x30] sm:$0xff] (!%p158_p3)   ;;  %v3879_v32 = vld [vmem:[%s4724_s1 + $0x38] sm:$0xff] (!%p158_p3)   ;;  %vm4103_vm2 = vmor (!%p158_p3), %vm918_vm0, %vm919_vm1 }
   0xe   : > { %v3878_v24 = vld [vmem:[%s4724_s1 + $0x130] sm:$0xff] (!%p158_p3)   ;;  %v3880_v38 = vld [vmem:[%s4724_s1 + $0x138] sm:$0xff] (!%p158_p3)   ;;  %v3883_v49 = vld [vmem:[%s4724_s1 + $0xc0] sm:$0xff] (!%p158_p3)  }
   0xf   : > { %3394 = vmatpush3.bf16.msra.mxu1 (!%p158_p3), %v3867_v2  ;;  %v3884_v55 = vld [vmem:[%s4724_s1 + $0x1c0] sm:$0xff] (!%p158_p3)   ;;  %v3885_v2 = vld [vmem:[%s4724_s1 + $0xc8] sm:$0xff] (!%p158_p3)   ;;  %vm4328_vm5 = vmor (!%p158_p3), %vm1885_vm3, %vm1886_vm4 }
  0x10   : > { %s4743_s13 = smov (!%p190_p5, %s3973_s13), 1  ;;  %3522 = vmatpush3.bf16.msra.mxu0 %v3868_v3  ;;  %3395 = vmatprep.subr.bf16.mxu1 %v3869_v4  ;;  %v3933_v33 = vld [vmem:[%s4724_s1 + $0x168] sm:$0xff]   ;;  %s4745_s10 = smov (!%p4576_p7, %s2956_s10), 15 }
  0x11   : > { %s193_s27 = scalar_select %p192_p6, %s3969_s12, 1  ;;  %3523 = vmatprep.subr.bf16.mxu0 %v3870_v5 }
  0x12   : > { %s3824_s30 = smul.u32 60, %s4743_s13  ;;  %s2957_s12 = sshll.u32 %s4745_s10, 1 }
  0x13   : > { %s3823_s6 = smul.u32 30, %s193_s27  ;;  %3396 = vmatpush3.bf16.msra.mxu1 %v3869_v4 }
  0x14   : > { %3524 = vmatpush3.bf16.msra.mxu0 %v3870_v5  ;;  %3397 = vmatprep.subr.bf16.mxu1 %v3871_v6 }
  0x15   : > { %s196_s9 = sadd.s32 %s3824_s30, %s3823_s6  ;;  %3525 = vmatprep.subr.bf16.mxu0 %v3872_v7 }
  0x16   : > { %s2955_s19 = sshll.u32 %s196_s9, 2 }
  0x17   : > { %s4080_s28 = scalar_lea.vmem %s4723_s0, %s2955_s19  ;;  %3398 = vmatpush3.bf16.msra.mxu1 %v3871_v6  ;;  %v3886_v6 = vld [vmem:[%s4724_s1 + $0x1c8] sm:$0xff]   ;;  %s2958_s19 = sshll.u32 %s4743_s13, 5 }
  0x18   : > { %3526 = vmatpush3.bf16.msra.mxu0 %v3872_v7  ;;  %3399 = vmatprep.subr.bf16.mxu1 %v3873_v8  ;;  %v3881_v12 = vld [vmem:[%s4080_s28] sm:$0xff]   ;;  %v891_v13 = vld [vmem:[%s4080_s28 + $0xc] sm:$0xf]  ;;  %v892_v14 = vld [vmem:[%s4080_s28 + $0x10] sm:$0xf]  ;;  %s4613_s13 = sadd.s32 %s2958_s19, %s2957_s12 }
  0x19   : > { %3527 = vmatprep.subr.bf16.mxu0 %v3874_v9  ;;  %v893_v15 = vld [vmem:[%s4080_s28 + $0x14] sm:$0x1]  ;;  %3407 = vmatprep.mubr.bf16.mxu1 %v3881_v12  ;;  %v946_v16 = vshrl.u32 %v891_v13, 16  ;;  %v949_v17 = vshll.u32 %v891_v13, 16  ;;  %v955_v19 = vshll.u32 %v892_v14, 16  ;;  %v959_v20 = vshrl.u32 %v892_v14, 16 }
  0x1a   : > { %v965_v21 = vshll.u32 %v893_v15, 16  ;;  %v894_v29 = vld [vmem:[%s4080_s28 + $0x18] sm:$0xf]  ;;  %v895_v30 = vld [vmem:[%s4080_s28 + $0x1c] sm:$0xf]  ;;  %v4120_v52 = vld [vmem:[%s4080_s28 + $0xc] sm:$0xff]  }
  0x1b   : > { %3400 = vmatpush3.bf16.msra.mxu1 %v3873_v8  ;;  %v948_v22 = vrot.slane %v946_v16, 4  ;;  %v951_v23 = vrot.slane %v949_v17, 5  ;;  %v957_v25 = vrot.slane %v955_v19, 5  ;;  %v961_v26 = vrot.slane %v959_v20, 4  ;;  %v896_v31 = vld [vmem:[%s4080_s28 + $0x20] sm:$0x1] }
  0x1c   : > { %3528 = vmatpush3.bf16.msra.mxu0 %v3874_v9  ;;  %3401 = vmatprep.subr.bf16.mxu1 %v3875_v10  ;;  %v967_v27 = vrot.slane %v965_v21, 5  ;;  %v970_v35 = vshrl.u32 %v894_v29, 16  ;;  %v973_v36 = vshll.u32 %v894_v29, 16  ;;  %v979_v37 = vshll.u32 %v895_v30, 16  ;;  %v897_v56 = vld [vmem:[%s4080_s28 + $0x24] sm:$0xf] }
  0x1d   : > { %3529 = vmatprep.subr.bf16.mxu0 %v3876_v11  ;;  %v952_v28 = vor.u32 %v951_v23, %v948_v22  ;;  %v962_v34 = vor.u32 %v961_v26, %v957_v25  ;;  %v983_v40 = vshrl.u32 %v895_v30, 16  ;;  %v989_v41 = vshll.u32 %v896_v31, 16  ;;  %v898_v58 = vld [vmem:[%s4080_s28 + $0x28] sm:$0xf]  ;;  %v899_v59 = vld [vmem:[%s4080_s28 + $0x2c] sm:$0x1] }
  0x1e   : > { %v972_v43 = vrot.slane %v970_v35, 4  ;;  %v975_v44 = vrot.slane %v973_v36, 5  ;;  %v981_v45 = vrot.slane %v979_v37, 5  ;;  %v994_v60 = vshrl.u32 %v897_v56, 16  ;;  %v900_v13 = vld [vmem:[%s4080_s28 + $0x30] sm:$0xf] }
  0x1f   : > { %3402 = vmatpush3.bf16.msra.mxu1 %v3875_v10  ;;  %v953_v39 = vrot.slane %v952_v28, 4  ;;  %v963_v42 = vrot.slane %v962_v34, 4  ;;  %v985_v47 = vrot.slane %v983_v40, 4  ;;  %v991_v54 = vrot.slane %v989_v41, 5  ;;  %v3889_v16 = vld [vmem:[%s4724_s1 + $0xd0] sm:$0xff]   ;;  %v3892_v41 = vld [vmem:[%s4724_s1 + $0x1d8] sm:$0xff]  }
  0x20   : > { %3530 = vmatpush3.bf16.msra.mxu0 %v3876_v11  ;;  %3403 = vmatprep.subr.bf16.mxu1 %v3877_v18  ;;  %v976_v50 = vor.u32 %v975_v44, %v972_v43  ;;  %v997_v62 = vshll.u32 %v897_v56, 16  ;;  %v1003_v63 = vshll.u32 %v898_v58, 16  ;;  %v1007_v0 = vshrl.u32 %v898_v58, 16  ;;  %v4142_v11 = vld [vmem:[%s4080_s28 + $0x18] sm:$0xff]   ;;  %v901_v17 = vld [vmem:[%s4080_s28 + $0x34] sm:$0xf] }
  0x21   : > { %3531 = vmatprep.subr.bf16.mxu0 %v3878_v24  ;;  %v958_v46 = vsel %vm4103_vm2, %v953_v39, %v957_v25  ;;  %v968_v48 = vsel %vm4103_vm2, %v963_v42, %v967_v27  ;;  %v986_v53 = vor.u32 %v985_v47, %v981_v45  ;;  %v996_v3 = vrot.slane %v994_v60, 4  ;;  %v4156_v27 = vld [vmem:[%s4080_s28 + $0x24] sm:$0xff]   ;;  %v4160_v34 = vld [vmem:[%s4080_s28 + $0x30] sm:$0xff]   ;;  %v903_v42 = vld [vmem:[%s4080_s28 + $0x3c] sm:$0xf]  ;;  %s2959_s22 = sshll.u32 %s4613_s13, 3 }
  0x22   : > { %v4117_v51 = vcombine.low %v958_v46, %v968_v48  ;;  %v977_v57 = vrot.slane %v976_v50, 4  ;;  %v1013_v4 = vshll.u32 %v899_v59, 16  ;;  %v999_v7 = vrot.slane %v997_v62, 5  ;;  %v904_v44 = vld [vmem:[%s4080_s28 + $0x40] sm:$0xf]  ;;  %s4642_s25 = scalar_lea.vmem %s4726_s3, %s2959_s22 }
  0x23   : > { %3404 = vmatpush3.bf16.msra.mxu1 %v3877_v18  ;;  %v987_v61 = vrot.slane %v986_v53, 4  ;;  %v1005_v8 = vrot.slane %v1003_v63, 5  ;;  %v1009_v9 = vrot.slane %v1007_v0, 4  ;;  %v902_v18 = vld [vmem:[%s4080_s28 + $0x38] sm:$0x1]  ;;  %v1018_v19 = vshrl.u32 %v900_v13, 16 }
  0x24   : > { %3532 = vmatpush3.bf16.msra.mxu0 %v3878_v24  ;;  %3405 = vmatprep.subr.bf16.mxu1 %v3879_v32  ;;  %v982_v1 = vsel %vm4103_vm2, %v977_v57, %v981_v45  ;;  %v1015_v12 = vrot.slane %v1013_v4, 5  ;;  %v1000_v14 = vor.u32 %v999_v7, %v996_v3  ;;  %v1021_v20 = vshll.u32 %v900_v13, 16  ;;  %v3890_v24 = vld [vmem:[%s4724_s1 + $0x1d0] sm:$0xff]   ;;  %v905_v45 = vld [vmem:[%s4080_s28 + $0x44] sm:$0x1]  ;;  %v4197_v7 = vld [vmem:[%s4080_s28 + $0x3c] sm:$0xff]  }
  0x25   : > { %3533 = vmatprep.subr.bf16.mxu0 %v3880_v38  ;;  %3535 = vmatprep.mubr.bf16.mxu0 %v4117_v51  ;;  %v992_v5 = vsel %vm4103_vm2, %v987_v61, %v991_v54  ;;  %v1010_v15 = vor.u32 %v1009_v9, %v1005_v8  ;;  %v1027_v21 = vshll.u32 %v901_v17, 16  ;;  %v1031_v22 = vshrl.u32 %v901_v17, 16  ;;  %v3895_v60 = vld [vmem:[%s4724_s1 + $0xe0] sm:$0xff]   ;;  %v906_v63 = vld [vmem:[%s4080_s28 + $0x48] sm:$0xf] }
  0x26   : > { %v4139_v10 = vcombine.low %v982_v1, %v992_v5  ;;  %v1037_v23 = vshll.u32 %v902_v18, 16  ;;  %v1001_v25 = vrot.slane %v1000_v14, 4  ;;  %v1020_v28 = vrot.slane %v1018_v19, 4  ;;  %v3896_v0 = vld [vmem:[%s4724_s1 + $0x1e0] sm:$0xff]   ;;  %v907_v3 = vld [vmem:[%s4080_s28 + $0x4c] sm:$0xf] }
  0x27   : > { %3406 = vmatpush3.bf16.msra.mxu1 %v3879_v32  ;;  %v1011_v26 = vrot.slane %v1010_v15, 4  ;;  %v1023_v29 = vrot.slane %v1021_v20, 5  ;;  %v1029_v30 = vrot.slane %v1027_v21, 5  ;;  %v1033_v31 = vrot.slane %v1031_v22, 4  ;;  %v908_v4 = vld [vmem:[%s4080_s28 + $0x50] sm:$0x1] }
  0x28   : > { %3534 = vmatpush3.bf16.msra.mxu0 %v3880_v38  ;;  %3423 = vmatprep.subr.bf16.mxu1 %v3883_v49  ;;  %v1039_v32 = vrot.slane %v1037_v23, 5  ;;  %v1006_v35 = vsel %vm4103_vm2, %v1001_v25, %v1005_v8  ;;  %v3891_v38 = vld [vmem:[%s4724_s1 + $0xd8] sm:$0xff]   ;;  %v1042_v46 = vshrl.u32 %v903_v42, 16  ;;  %v1045_v48 = vshll.u32 %v903_v42, 16  ;;  %v3897_v17 = vld [vmem:[%s4724_s1 + $0xe8] sm:$0xff]  }
  0x29   : > { %3551 = vmatprep.subr.bf16.mxu0 %v3884_v55  ;;  %v1016_v36 = vsel %vm4103_vm2, %v1011_v26, %v1015_v12  ;;  %v1024_v37 = vor.u32 %v1023_v29, %v1020_v28  ;;  %v1034_v40 = vor.u32 %v1033_v31, %v1029_v30  ;;  %v1055_v50 = vshrl.u32 %v904_v44, 16  ;;  %v3898_v18 = vld [vmem:[%s4724_s1 + $0x1e8] sm:$0xff]   ;;  %v909_v29 = vld [vmem:[%s4080_s28 + $0x54] sm:$0xf]  ;;  %v910_v31 = vld [vmem:[%s4080_s28 + $0x58] sm:$0xf] }
  0x2a   : > { %3408 = vmatmul.mubr.bf16.vlgmr.msra.gmra.mrb[0].mxu1 %v4120_v52  ;;  %v4169_v39 = vcombine.low %v1006_v35, %v1016_v36  ;;  %v1044_v54 = vrot.slane %v1042_v46, 4  ;;  %v1047_v57 = vrot.slane %v1045_v48, 5  ;;  %v1066_v5 = vshrl.u32 %v906_v63, 16  ;;  %v4206_v22 = vld [vmem:[%s4080_s28 + $0x48] sm:$0xff]  }
  0x2b   : > { %3536 = vmatmul.mubr.bf16.vlgmr.msra.gmra.mrb[0].mxu0 %v4139_v10  ;;  %3424 = vmatpush3.bf16.msra.mxu1 %v3883_v49  ;;  %v1025_v43 = vrot.slane %v1024_v37, 4  ;;  %v1035_v47 = vrot.slane %v1034_v40, 4  ;;  %v1051_v49 = vshll.u32 %v904_v44, 16  ;;  %v1057_v59 = vrot.slane %v1055_v50, 4  ;;  %v4223_v44 = vld [vmem:[%s4080_s28 + $0x54] sm:$0xff]  }
  0x2c   : > { %3552 = vmatpush3.bf16.msra.mxu0 %v3884_v55  ;;  %3425 = vmatprep.subr.bf16.mxu1 %v3885_v2  ;;  %v1061_v55 = vshll.u32 %v905_v45, 16  ;;  %v1048_v1 = vor.u32 %v1047_v57, %v1044_v54  ;;  %v1075_v8 = vshll.u32 %v907_v3, 16  ;;  %v1079_v9 = vshrl.u32 %v907_v3, 16  ;;  %v3901_v45 = vld [vmem:[%s4724_s1 + $0xf0] sm:$0xff]   ;;  %v3904_v3 = vld [vmem:[%s4724_s1 + $0x1f8] sm:$0xff]  }
  0x2d   : > { %3553 = vmatprep.subr.bf16.mxu0 %v3886_v6  ;;  %3411 = vmatprep.mubr.bf16.mxu1 %v4142_v11  ;;  %v1030_v53 = vsel %vm4103_vm2, %v1025_v43, %v1029_v30  ;;  %v1040_v56 = vsel %vm4103_vm2, %v1035_v47, %v1039_v32  ;;  %v1053_v58 = vrot.slane %v1051_v49, 5  ;;  %v1085_v12 = vshll.u32 %v908_v4, 16  ;;  %v911_v32 = vld [vmem:[%s4080_s28 + $0x5c] sm:$0x1]  ;;  %v3902_v50 = vld [vmem:[%s4724_s1 + $0x1f0] sm:$0xff]  }
  0x2e   : > { %3539 = vmatprep.mubr.bf16.mxu0 %v4169_v39  ;;  %v4187_v61 = vcombine.low %v1030_v53, %v1040_v56  ;;  %v1063_v62 = vrot.slane %v1061_v55, 5  ;;  %v1049_v13 = vrot.slane %v1048_v1, 4  ;;  %v1068_v15 = vrot.slane %v1066_v5, 4  ;;  %v912_v55 = vld [vmem:[%s4080_s28 + $0x60] sm:$0xf]  ;;  %v3903_v56 = vld [vmem:[%s4724_s1 + $0xf8] sm:$0xff]  }
  0x2f   : > { %3426 = vmatpush3.bf16.msra.mxu1 %v3885_v2  ;;  %v1058_v2 = vor.u32 %v1057_v59, %v1053_v58  ;;  %v1077_v19 = vrot.slane %v1075_v8, 5  ;;  %v1081_v20 = vrot.slane %v1079_v9, 4  ;;  %v1087_v21 = vrot.slane %v1085_v12, 5  ;;  %v913_v59 = vld [vmem:[%s4080_s28 + $0x64] sm:$0xf] }
  0x30   : > { %3554 = vmatpush3.bf16.msra.mxu0 %v3886_v6  ;;  %3427 = vmatprep.subr.bf16.mxu1 %v3889_v16  ;;  %v1069_v6 = vshll.u32 %v906_v63, 16  ;;  %v1054_v23 = vsel %vm4103_vm2, %v1049_v13, %v1053_v58  ;;  %v1090_v35 = vshrl.u32 %v909_v29, 16  ;;  %v1093_v37 = vshll.u32 %v909_v29, 16  ;;  %v3909_v29 = vld [vmem:[%s4724_s1 + $0x190] sm:$0xff]  }
  0x31   : > { %3555 = vmatprep.subr.bf16.mxu0 %v3890_v24  ;;  %v1059_v14 = vrot.slane %v1058_v2, 4  ;;  %v1082_v28 = vor.u32 %v1081_v20, %v1077_v19  ;;  %v1103_v40 = vshrl.u32 %v910_v31, 16  ;;  %v1109_v43 = vshll.u32 %v911_v32, 16  ;;  %v915_v32 = vld [vmem:[%s4080_s28 + $0x6c] sm:$0xf] }
  0x32   : > { %3412 = vmatmul.mubr.bf16.gmra.mrb[4].mxu1 %v4156_v27  ;;  %v1092_v42 = vrot.slane %v1090_v35, 4  ;;  %v1095_v47 = vrot.slane %v1093_v37, 5  ;;  %v1359_v63 = vshll.u32 %v912_v55, 16  ;;  %v1369_v1 = vshrl.u32 %v913_v59, 16  ;;  %v916_v35 = vld [vmem:[%s4080_s28 + $0x70] sm:$0xf] }
  0x33   : > { %3428 = vmatpush3.bf16.msra.mxu1 %v3889_v16  ;;  %3415 = vmatprep.mubr.bf16.mxu1 %v4160_v34  ;;  %v1071_v16 = vrot.slane %v1069_v6, 5  ;;  %v1083_v36 = vrot.slane %v1082_v28, 4  ;;  %v1105_v49 = vrot.slane %v1103_v40, 4  ;;  %v1111_v54 = vrot.slane %v1109_v43, 5  ;;  %v3915_v43 = vld [vmem:[%s4724_s1 + $0x1a8] sm:$0xff]  }
  0x34   : > { %3556 = vmatpush3.bf16.msra.mxu0 %v3890_v24  ;;  %3429 = vmatprep.subr.bf16.mxu1 %v3891_v38  ;;  %v1064_v24 = vsel %vm4103_vm2, %v1059_v14, %v1063_v62  ;;  %v1096_v57 = vor.u32 %v1095_v47, %v1092_v42  ;;  %v1356_v62 = vshrl.u32 %v912_v55, 16  ;;  %v1361_v8 = vrot.slane %v1359_v63, 5  ;;  %v3905_v14 = vld [vmem:[%s4724_s1 + $0x180] sm:$0xff]   ;;  %v3910_v42 = vld [vmem:[%s4724_s1 + $0x90] sm:$0xff]  }
  0x35   : > { %3557 = vmatprep.subr.bf16.mxu0 %v3892_v41  ;;  %3540 = vmatmul.mubr.bf16.gmra.mrb[4].mxu0 %v4187_v61  ;;  %v1072_v25 = vor.u32 %v1071_v16, %v1068_v15  ;;  %v4212_v26 = vcombine.low %v1054_v23, %v1064_v24  ;;  %v1088_v46 = vsel %vm4103_vm2, %v1083_v36, %v1087_v21  ;;  %v1371_v12 = vrot.slane %v1369_v1, 4  ;;  %v3907_v24 = vld [vmem:[%s4724_s1 + $0x188] sm:$0xff]   ;;  %v3913_v36 = vld [vmem:[%s4724_s1 + $0x1a0] sm:$0xff]   ;;  %v917_v47 = vld [vmem:[%s4080_s28 + $0x74] sm:$0x1] }
  0x36   : > { %v1097_v4 = vrot.slane %v1096_v57, 4  ;;  %v1358_v6 = vrot.slane %v1356_v62, 4  ;;  %v1594_v37 = vshrl.u32 %v915_v32, 16  ;;  %v1603_v40 = vshll.u32 %v916_v35, 16  ;;  %v3914_v55 = vld [vmem:[%s4724_s1 + $0xa0] sm:$0xff]   ;;  %v3916_v1 = vld [vmem:[%s4724_s1 + $0xa8] sm:$0xff]  }
  0x37   : > { %3430 = vmatpush3.bf16.msra.mxu1 %v3891_v38  ;;  %v1073_v30 = vrot.slane %v1072_v25, 4  ;;  %3543 = vmatprep.mubr.bf16.mxu0 %v4212_v26  ;;  %v1099_v38 = vshll.u32 %v910_v31, 16  ;;  %v3908_v31 = vld [vmem:[%s4724_s1 + $0x88] sm:$0xff]   ;;  %v4317_v62 = vld [vmem:[%s4080_s28 + $0x60] sm:$0xff]  }
  0x38   : > { %3558 = vmatpush3.bf16.msra.mxu0 %v3892_v41  ;;  %3431 = vmatprep.subr.bf16.mxu1 %v3895_v60 }
  0x39   : > { %3559 = vmatprep.subr.bf16.mxu0 %v3896_v0  ;;  %v1078_v41 = vsel %vm4103_vm2, %v1073_v30, %v1077_v19  ;;  %v1101_v48 = vrot.slane %v1099_v38, 5  ;;  %v3911_v30 = vld [vmem:[%s4724_s1 + $0x198] sm:$0xff]   ;;  %v1597_v38 = vshll.u32 %v915_v32, 16 }
  0x3a   : > { %3416 = vmatmul.mubr.bf16.gmra.mrb[8].mxu1 %v4197_v7  ;;  %v4233_v53 = vcombine.low %v1078_v41, %v1088_v46  ;;  %v1607_v41 = vshrl.u32 %v916_v35, 16  ;;  %v3924_v35 = vld [vmem:[%s4724_s1 + $0x48] sm:$0xff]  }
  0x3b   : > { %3432 = vmatpush3.bf16.msra.mxu1 %v3895_v60  ;;  %3419 = vmatprep.mubr.bf16.mxu1 %v4206_v22  ;;  %v1106_v58 = vor.u32 %v1105_v49, %v1101_v48  ;;  %v914_v60 = vld [vmem:[%s4080_s28 + $0x68] sm:$0x1]  ;;  %v1102_v15 = vsel %vm4103_vm2, %v1097_v4, %v1101_v48  ;;  %v1599_v46 = vrot.slane %v1597_v38, 5  ;;  %v4298_v48 = vrot.slane %v1603_v40, 5  ;;  %v3920_v4 = vld [vmem:[%s4724_s1 + $0x1b8] sm:$0xff]  }
  0x3c   : > { %3560 = vmatpush3.bf16.msra.mxu0 %v3896_v0  ;;  %3433 = vmatprep.subr.bf16.mxu1 %v3897_v17  ;;  %v1365_v0 = vshll.u32 %v913_v59, 16  ;;  %v1375_v2 = vshll.u32 %v914_v60, 16  ;;  %v1609_v49 = vrot.slane %v1607_v41, 4  ;;  %v1831_v60 = vld [vmem:[%s4080_s28] sm:$0xe] }
  0x3d   : > { %3561 = vmatprep.subr.bf16.mxu0 %v3898_v18  ;;  %3544 = vmatmul.mubr.bf16.gmra.mrb[8].mxu0 %v4233_v53  ;;  %v1107_v5 = vrot.slane %v1106_v58, 4  ;;  %v1613_v58 = vshll.u32 %v917_v47, 16  ;;  %v3926_v47 = vld [vmem:[%s4724_s1 + $0x50] sm:$0xff]  }
  0x3e   : > { %v1367_v9 = vrot.slane %v1365_v0, 5  ;;  %v1377_v13 = vrot.slane %v1375_v2, 5  ;;  %v1610_v59 = vor.u32 %v1609_v49, %v4298_v48  ;;  %v1833_v0 = vld [vmem:[%s4080_s28 + $0x8] sm:$0x1] }
  0x3f   : > { %3434 = vmatpush3.bf16.msra.mxu1 %v3897_v17  ;;  %v1112_v16 = vsel %vm4103_vm2, %v1107_v5, %v1111_v54  ;;  %v1362_v17 = vor.u32 %v1361_v8, %v1358_v6  ;;  %v1832_v54 = vld [vmem:[%s4080_s28 + $0x4] sm:$0xf]  ;;  %v3108_v6 = vrot.slane %v1831_v60, 9  ;;  %v1835_v8 = vld [vmem:[%s4080_s28 + $0x10] sm:$0xf] }
  0x40   : > { %3562 = vmatpush3.bf16.msra.mxu0 %v3898_v18  ;;  %3435 = vmatprep.subr.bf16.mxu1 %v3901_v45  ;;  %v4254_v18 = vcombine.low %v1102_v15, %v1112_v16  ;;  %v1372_v19 = vor.u32 %v1371_v12, %v1367_v9  ;;  %v1890_v63 = vrot.slane %v1832_v54, 5  ;;  %v1611_v5 = vrot.slane %v1610_v59, 4  ;;  %v1838_v15 = vld [vmem:[%s4080_s28 + $0x1c] sm:$0xf]  ;;  %v1836_v16 = vld [vmem:[%s4080_s28 + $0x14] sm:$0x1] }
  0x41   : > { %3563 = vmatprep.subr.bf16.mxu0 %v3902_v50  ;;  %v1363_v20 = vrot.slane %v1362_v17, 4  ;;  %v3922_v17 = vld [vmem:[%s4724_s1 + $0x40] sm:$0xff]   ;;  %v4387_v59 = vld [vmem:[%s4080_s28 + $0x3c] sm:$0xe] }
  0x42   : > { %3420 = vmatmul.mubr.bf16.gmra.mrb[12].mxu1 %v4223_v44  ;;  %3547 = vmatprep.mubr.bf16.mxu0 %v4254_v18  ;;  %v1373_v21 = vrot.slane %v1372_v19, 4  ;;  %v1892_v12 = vrot.slane %v1890_v63, 4  ;;  %v1897_v19 = vrot.slane %v1835_v8, 5  ;;  %v4390_v60 = vld [vmem:[%s4080_s28 + $0x44] sm:$0x1] }
  0x43   : > { %3436 = vmatpush3.bf16.msra.mxu1 %v3901_v45  ;;  %3439 = vmatprep.mubr.bf16.mxu1 %v4120_v52  ;;  %v3906_v52 = vld [vmem:[%s4724_s1 + $0x80] sm:$0xff]   ;;  %v1368_v23 = vsel %vm4103_vm2, %v1363_v20, %v1367_v9  ;;  %v1596_v45 = vrot.slane %v1594_v37, 4  ;;  %v3921_v37 = vld [vmem:[%s4724_s1 + $0xb8] sm:$0xff]  }
  0x44   : > { %3564 = vmatpush3.bf16.msra.mxu0 %v3902_v50  ;;  %3437 = vmatprep.subr.bf16.mxu1 %v3903_v56  ;;  %v1378_v25 = vsel %vm4103_vm2, %v1373_v21, %v1377_v13  ;;  %v3912_v50 = vld [vmem:[%s4724_s1 + $0x98] sm:$0xff]   ;;  %v1893_v13 = vrot.slane %v1833_v0, 5  ;;  %v3919_v21 = vld [vmem:[%s4724_s1 + $0xb0] sm:$0xff]   ;;  %v1899_v32 = vrot.slane %v1897_v19, 4 }
  0x45   : > { %3565 = vmatprep.subr.bf16.mxu0 %v3904_v3  ;;  %v4267_v28 = vcombine.low %v1368_v23, %v1378_v25  ;;  %v1600_v57 = vor.u32 %v1599_v46, %v1596_v45  ;;  %v1891_v23 = vsel %vm4328_vm5, %v3108_v6, %v1890_v63  ;;  %v1837_v25 = vld [vmem:[%s4080_s28 + $0x18] sm:$0xe]  ;;  %v1842_v45 = vld [vmem:[%s4080_s28 + $0x2c] sm:$0x1]  ;;  %v1844_v46 = vld [vmem:[%s4080_s28 + $0x34] sm:$0xf] }
  0x46   : > { %v3110_v40 = vrot.slane %v1837_v25, 9  ;;  %v888_v25 = vld [vmem:[%s4080_s28] sm:$0xf] }
  0x47   : > { %3438 = vmatpush3.bf16.msra.mxu1 %v3903_v56  ;;  %3548 = vmatmul.mubr.bf16.gmra.mrb[12].mxu0 %v4267_v28  ;;  %v3918_v56 = vld [vmem:[%s4724_s1 + $0x1b0] sm:$0xff]   ;;  %v1601_v2 = vrot.slane %v1600_v57, 4  ;;  %v1918_v57 = vrot.slane %v1844_v46, 5 }
  0x48   : > { %3566 = vmatpush3.bf16.msra.mxu0 %v3904_v3  ;;  %3455 = vmatprep.subr.bf16.mxu1 %v3905_v14  ;;  %v1615_v3 = vrot.slane %v1613_v58, 5  ;;  %v4384_v58 = vld [vmem:[%s4080_s28 + $0x40] sm:$0xf] }
  0x49   : > { %3583 = vmatprep.subr.bf16.mxu0 %v3906_v52  ;;  %3567 = vmatprep.mubr.bf16.mxu0 %v4139_v10  ;;  %v1606_v20 = vsel %vm4103_vm2, %v1601_v2, %v4298_v48  ;;  %v3925_v2 = vld [vmem:[%s4724_s1 + $0x148] sm:$0xff]   ;;  %v1925_v8 = vrot.slane %v4384_v58, 5 }
  0x4a   : > { %3440 = vmatmul.mubr.bf16.vlgmr.msra.gmra.mrb[0].mxu1 %v4142_v11 }
  0x4b   : > { %3456 = vmatpush3.bf16.msra.mxu1 %v3905_v14  ;;  %3443 = vmatprep.mubr.bf16.mxu1 %v4156_v27  ;;  %v1834_v14 = vld [vmem:[%s4080_s28 + $0xc] sm:$0xe] }
  0x4c   : > { %3457 = vmatprep.subr.bf16.mxu1 %v3907_v24 }
  0x4f   : > { %3458 = vmatpush3.bf16.msra.mxu1 %v3907_v24  ;;  %3568 = vmatmul.mubr.bf16.vlgmr.msra.gmra.mrb[0].mxu0 %v4169_v39  ;;  %v1894_v24 = vsel %vm4328_vm5, %v1892_v12, %v1893_v13  ;;  %v1920_v12 = vrot.slane %v1918_v57, 4 }
  0x50   : > { %3459 = vmatprep.subr.bf16.mxu1 %v3909_v29  ;;  %3584 = vmatpush3.bf16.msra.mxu0 %v3906_v52  ;;  %v1904_v52 = vrot.slane %v1838_v15, 5  ;;  %v3132_v38 = vcombine.low %v1891_v23, %v1894_v24  ;;  %v1928_v15 = vrot.slane %v4390_v60, 5 }
  0x51   : > { %3571 = vmatprep.mubr.bf16.mxu0 %v4187_v61  ;;  %3585 = vmatprep.subr.bf16.mxu0 %v3908_v31 }
  0x52   : > { %3444 = vmatmul.mubr.bf16.gmra.mrb[4].mxu1 %v4160_v34  ;;  %v1906_v41 = vrot.slane %v1904_v52, 4  ;;  %v1905_v54 = vsel %vm4328_vm5, %v3110_v40, %v1904_v52  ;;  %v3927_v52 = vld [vmem:[%s4724_s1 + $0x150] sm:$0xff]  }
  0x53   : > { %3460 = vmatpush3.bf16.msra.mxu1 %v3909_v29  ;;  %3447 = vmatprep.mubr.bf16.mxu1 %v4197_v7  ;;  %v3109_v29 = vrot.slane %v1834_v14, 9  ;;  %v3113_v14 = vrot.slane %v4387_v59, 9  ;;  %v3934_v59 = vld [vmem:[%s4080_s28 + $0x6c] sm:$0xff]  }
  0x54   : > { %3461 = vmatprep.subr.bf16.mxu1 %v3911_v30  ;;  %3586 = vmatpush3.bf16.msra.mxu0 %v3908_v31 }
  0x55   : > { %3587 = vmatprep.subr.bf16.mxu0 %v3910_v42  ;;  %v1898_v49 = vsel %vm4328_vm5, %v3109_v29, %v1897_v19  ;;  %v1849_v19 = vld [vmem:[%s4080_s28 + $0x48] sm:$0xe]  ;;  %v890_v29 = vld [vmem:[%s4080_s28 + $0x8] sm:$0x1] }
  0x56   : > { %v941_v40 = vshll.u32 %v890_v29, 16 }
  0x57   : > { %3462 = vmatpush3.bf16.msra.mxu1 %v3911_v30  ;;  %3572 = vmatmul.mubr.bf16.gmra.mrb[4].mxu0 %v4212_v26  ;;  %v1900_v30 = vrot.slane %v1836_v16, 5  ;;  %v4406_v16 = vld [vmem:[%s4080_s28 + $0x4c] sm:$0xf] }
  0x58   : > { %3463 = vmatprep.subr.bf16.mxu1 %v3913_v36  ;;  %3588 = vmatpush3.bf16.msra.mxu0 %v3910_v42  ;;  %v1932_v23 = vrot.slane %v4406_v16, 5 }
  0x59   : > { %3575 = vmatprep.mubr.bf16.mxu0 %v4233_v53  ;;  %3589 = vmatprep.subr.bf16.mxu0 %v3912_v50 }
  0x5a   : > { %3448 = vmatmul.mubr.bf16.gmra.mrb[8].mxu1 %v4206_v22 }
  0x5b   : > { %3464 = vmatpush3.bf16.msra.mxu1 %v3913_v36  ;;  %3451 = vmatprep.mubr.bf16.mxu1 %v4223_v44  ;;  %v1841_v36 = vld [vmem:[%s4080_s28 + $0x28] sm:$0xf] }
  0x5c   : > { %3465 = vmatprep.subr.bf16.mxu1 %v3915_v43  ;;  %3590 = vmatpush3.bf16.msra.mxu0 %v3912_v50  ;;  %v1911_v48 = vrot.slane %v1841_v36, 5  ;;  %v1843_v50 = vld [vmem:[%s4080_s28 + $0x30] sm:$0xe] }
  0x5d   : > { %3591 = vmatprep.subr.bf16.mxu0 %v3914_v55  ;;  %v3112_v6 = vrot.slane %v1843_v50, 9 }
  0x5f   : > { %3466 = vmatpush3.bf16.msra.mxu1 %v3915_v43  ;;  %3576 = vmatmul.mubr.bf16.gmra.mrb[8].mxu0 %v4254_v18  ;;  %v1840_v43 = vld [vmem:[%s4080_s28 + $0x24] sm:$0xe] }
  0x60   : > { %3467 = vmatprep.subr.bf16.mxu1 %v3918_v56  ;;  %3592 = vmatpush3.bf16.msra.mxu0 %v3914_v55  ;;  %v3111_v0 = vrot.slane %v1840_v43, 9 }
  0x61   : > { %3579 = vmatprep.mubr.bf16.mxu0 %v4267_v28  ;;  %3593 = vmatprep.subr.bf16.mxu0 %v3916_v1  ;;  %v1839_v28 = vld [vmem:[%s4080_s28 + $0x20] sm:$0x1] }
  0x62   : > { %3452 = vmatmul.mubr.bf16.gmra.mrb[12].mxu1 %v4317_v62  ;;  %v1907_v42 = vrot.slane %v1839_v28, 5  ;;  %v889_v28 = vld [vmem:[%s4080_s28 + $0x4] sm:$0xf] }
  0x63   : > { %3468 = vmatpush3.bf16.msra.mxu1 %v3918_v56  ;;  %3471 = vmatprep.mubr.bf16.mxu1 %v4142_v11  ;;  %v1616_v11 = vsel %vm4103_vm2, %v1611_v5, %v1615_v3  ;;  %v1845_v56 = vld [vmem:[%s4080_s28 + $0x38] sm:$0x1]  ;;  %v931_v36 = vshll.u32 %v889_v28, 16 }
  0x64   : > { %3469 = vmatprep.subr.bf16.mxu1 %v3920_v4  ;;  %v3099_v31 = vcombine.low %v1606_v20, %v1616_v11  ;;  %3594 = vmatpush3.bf16.msra.mxu0 %v3916_v1  ;;  %v1908_v55 = vsel %vm4328_vm5, %v1906_v41, %v1907_v42  ;;  %v1914_v1 = vrot.slane %v1842_v45, 5  ;;  %v3928_v5 = vld [vmem:[%s4724_s1 + $0x58] sm:$0xff]   ;;  %v1921_v13 = vrot.slane %v1845_v56, 5  ;;  %v1851_v20 = vld [vmem:[%s4080_s28 + $0x50] sm:$0x1] }
  0x65   : > { %3595 = vmatprep.subr.bf16.mxu0 %v3919_v21  ;;  %v4397_v3 = vcombine.low %v1905_v54, %v1908_v55  ;;  %v1912_v11 = vsel %vm4328_vm5, %v3111_v0, %v1911_v48  ;;  %v3929_v41 = vld [vmem:[%s4724_s1 + $0x158] sm:$0xff]   ;;  %v1935_v42 = vrot.slane %v1851_v20, 5  ;;  %v933_v46 = vrot.slane %v931_v36, 5  ;;  %v3935_v55 = vld [vmem:[%s4724_s1 + $0x70] sm:$0xff]  }
  0x66   : > { %v1922_v24 = vsel %vm4328_vm5, %v1920_v12, %v1921_v13  ;;  %v943_v54 = vrot.slane %v941_v40, 5  ;;  %v3937_v12 = vld [vmem:[%s4724_s1 + $0x78] sm:$0xff]   ;;  %v1860_v36 = vld [vmem:[%s4080_s28 + $0x74] sm:$0x1] }
  0x67   : > { %3470 = vmatpush3.bf16.msra.mxu1 %v3920_v4  ;;  %3580 = vmatmul.mubr.bf16.gmra.mrb[12].mxu0 %v3099_v31  ;;  %v1913_v4 = vrot.slane %v1911_v48, 4  ;;  %v3114_v31 = vrot.slane %v1849_v19, 9  ;;  %v1934_v48 = vrot.slane %v1932_v23, 4  ;;  %v3939_v19 = vld [vmem:[%s4724_s1 + $0x200] sm:$0xff]  }
  0x68   : > { %3487 = vmatprep.subr.bf16.mxu1 %v3922_v17  ;;  %3596 = vmatpush3.bf16.msra.mxu0 %v3919_v21  ;;  %v1927_v21 = vrot.slane %v1925_v8, 4 }
  0x69   : > { %3599 = vmatprep.mubr.bf16.mxu0 %v3132_v38  ;;  %3597 = vmatprep.subr.bf16.mxu0 %v3921_v37  ;;  %v935_v38 = vshrl.u32 %v889_v28, 16  ;;  %v1936_v58 = vsel %vm4328_vm5, %v1934_v48, %v1935_v42  ;;  %v1857_v28 = vld [vmem:[%s4080_s28 + $0x68] sm:$0x1]  ;;  %v2418_v42 = vrot.slane %v1860_v36, 5 }
  0x6a   : > { %3472 = vmatmul.mubr.bf16.vlgmr.msra.gmra.mrb[0].mxu1 %v4156_v27  ;;  %v1901_v27 = vsel %vm4328_vm5, %v1899_v32, %v1900_v30  ;;  %v3932_v30 = vld [vmem:[%s4724_s1 + $0x68] sm:$0xff]   ;;  %v922_v32 = vshrl.u32 %v888_v25, 16 }
  0x6b   : > { %3488 = vmatpush3.bf16.msra.mxu1 %v3922_v17  ;;  %3475 = vmatprep.mubr.bf16.mxu1 %v4160_v34  ;;  %v3923_v34 = vld [vmem:[%s4724_s1 + $0x140] sm:$0xff]   ;;  %v4392_v63 = vcombine.low %v1898_v49, %v1901_v27  ;;  %v937_v49 = vrot.slane %v935_v38, 4  ;;  %v1853_v27 = vld [vmem:[%s4080_s28 + $0x58] sm:$0xf] }
  0x6c   : > { %3489 = vmatprep.subr.bf16.mxu1 %v3924_v35  ;;  %3598 = vmatpush3.bf16.msra.mxu0 %v3921_v37  ;;  %v3930_v17 = vld [vmem:[%s4724_s1 + $0x60] sm:$0xff]   ;;  %v924_v43 = vrot.slane %v922_v32, 4  ;;  %v1939_v60 = vrot.slane %v1853_v27, 5 }
  0x6d   : > { %3615 = vmatprep.subr.bf16.mxu0 %v3923_v34 }
  0x6e   : > { %v1941_v16 = vrot.slane %v1939_v60, 4 }
  0x6f   : > { %3490 = vmatpush3.bf16.msra.mxu1 %v3924_v35  ;;  %3600 = vmatmul.mubr.bf16.vlgmr.msra.gmra.mrb[0].mxu0 %v4392_v63  ;;  %v925_v35 = vshll.u32 %v888_v25, 16  ;;  %v1855_v25 = vld [vmem:[%s4080_s28 + $0x60] sm:$0xe] }
  0x70   : > { %3491 = vmatprep.subr.bf16.mxu1 %v3926_v47  ;;  %3616 = vmatpush3.bf16.msra.mxu0 %v3923_v34  ;;  %v938_v34 = vor.u32 %v937_v49, %v933_v46  ;;  %v3148_v29 = vrot.slane %v1855_v25, 9 }
  0x71   : > { %3603 = vmatprep.mubr.bf16.mxu0 %v4397_v3  ;;  %3617 = vmatprep.subr.bf16.mxu0 %v3925_v2  ;;  %v927_v45 = vrot.slane %v925_v35, 5  ;;  %v1858_v35 = vld [vmem:[%s4080_s28 + $0x6c] sm:$0xe] }
  0x72   : > { %3476 = vmatmul.mubr.bf16.gmra.mrb[4].mxu1 %v4197_v7  ;;  %v1915_v7 = vsel %vm4328_vm5, %v1913_v4, %v1914_v1  ;;  %v939_v0 = vrot.slane %v938_v34, 4  ;;  %v1933_v1 = vsel %vm4328_vm5, %v3114_v31, %v1932_v23  ;;  %v1854_v4 = vld [vmem:[%s4080_s28 + $0x5c] sm:$0x1]  ;;  %v2194_v31 = vrot.slane %v1857_v28, 5 }
  0x73   : > { %3492 = vmatpush3.bf16.msra.mxu1 %v3926_v47  ;;  %3479 = vmatprep.mubr.bf16.mxu1 %v4206_v22  ;;  %v1919_v22 = vsel %vm4328_vm5, %v3112_v6, %v1918_v57  ;;  %v4437_v37 = vcombine.low %v1912_v11, %v1915_v7  ;;  %v928_v50 = vor.u32 %v927_v45, %v924_v43  ;;  %v3931_v57 = vld [vmem:[%s4724_s1 + $0x160] sm:$0xff]   ;;  %v3936_v7 = vld [vmem:[%s4724_s1 + $0x170] sm:$0xff]   ;;  %v3938_v23 = vld [vmem:[%s4724_s1 + $0x178] sm:$0xff]  }
  0x74   : > { %3493 = vmatprep.subr.bf16.mxu1 %v3928_v5  ;;  %3618 = vmatpush3.bf16.msra.mxu0 %v3925_v2  ;;  %v4442_v47 = vcombine.low %v1919_v22, %v1922_v24  ;;  %v1852_v2 = vld [vmem:[%s4080_s28 + $0x54] sm:$0xe]  ;;  %v944_v6 = vsel %vm4103_vm2, %v939_v0, %v943_v54 }
  0x75   : > { %3619 = vmatprep.subr.bf16.mxu0 %v3927_v52  ;;  %v929_v56 = vrot.slane %v928_v50, 4  ;;  %v3941_v22 = vld [vmem:[%s4724_s1 + $0x210] sm:$0xff]  }
  0x77   : > { %3494 = vmatpush3.bf16.msra.mxu1 %v3928_v5  ;;  %3604 = vmatmul.mubr.bf16.gmra.mrb[4].mxu0 %v4437_v37  ;;  %v934_v5 = vsel %vm4103_vm2, %v929_v56, %v933_v46  ;;  %v3243_v56 = vld [vmem:[%s4080_s28 + $0x18] sm:$0xff]  }
  0x78   : > { %3495 = vmatprep.subr.bf16.mxu1 %v3930_v17  ;;  %3620 = vmatpush3.bf16.msra.mxu0 %v3927_v52  ;;  %v3042_v13 = vcombine.low %v934_v5, %v944_v6  ;;  %v3229_v0 = vunpack.c.l.bf16 %v3243_v56  ;;  %v3202_v6 = vld [vmem:[%s4080_s28 + $0x14] sm:$0x1] }
  0x79   : > { %3607 = vmatprep.mubr.bf16.mxu0 %v4442_v47  ;;  %3621 = vmatprep.subr.bf16.mxu0 %v3929_v41 }
  0x7a   : > { %3480 = vmatmul.mubr.bf16.gmra.mrb[8].mxu1 %v4223_v44  ;;  %v1926_v44 = vsel %vm4328_vm5, %v3113_v14, %v1925_v8  ;;  %v4477_v14 = vcombine.low %v1933_v1, %v1936_v58  ;;  %v3205_v1 = vld [vmem:[%s4080_s28 + $0x20] sm:$0x1]  ;;  %v3217_v58 = vld [vmem:[%s4080_s28 + $0x50] sm:$0x1] }
  0x7b   : > { %3496 = vmatpush3.bf16.msra.mxu1 %v3930_v17  ;;  %3483 = vmatprep.mubr.bf16.mxu1 %v4317_v62  ;;  %v1929_v62 = vsel %vm4328_vm5, %v1927_v21, %v1928_v15  ;;  %v3115_v15 = vrot.slane %v1852_v2, 9  ;;  %v1942_v17 = vrot.slane %v1854_v4, 5  ;;  %v3940_v21 = vld [vmem:[%s4724_s1 + $0x208] sm:$0xff]   ;;  %v3230_v2 = vunpack.c.h.bf16 %v3243_v56 }
  0x7c   : > { %3497 = vmatprep.subr.bf16.mxu1 %v3932_v30  ;;  %v4472_v8 = vcombine.low %v1926_v44, %v1929_v62  ;;  %3622 = vmatpush3.bf16.msra.mxu0 %v3929_v41  ;;  %v3245_v62 = vld [vmem:[%s4080_s28 + $0x48] sm:$0xff]  }
  0x7d   : > { %3623 = vmatprep.subr.bf16.mxu0 %v3931_v57  ;;  %v1940_v20 = vsel %vm4328_vm5, %v3115_v15, %v1939_v60  ;;  %v1943_v11 = vsel %vm4328_vm5, %v1941_v16, %v1942_v17  ;;  %v3212_v60 = vld [vmem:[%s4080_s28 + $0x3c] sm:$0xff]   ;;  %v3237_v4 = vunpack.c.l.bf16 %v3245_v62  ;;  %v3238_v5 = vunpack.c.h.bf16 %v3245_v62  ;;  %v4611_v62 = vld [vmem:[%s4080_s28 + $0x24] sm:$0xff]  }
  0x7e   : > { %v4494_v52 = vcombine.low %v1940_v20, %v1943_v11  ;;  %v2688_v15 = vunpack.c.h.bf16 %v3212_v60  ;;  %v2680_v16 = vunpack.c.l.bf16 %v3205_v1  ;;  %v2692_v17 = vunpack.c.l.bf16 %v3217_v58 }
  0x7f   : > { %3498 = vmatpush3.bf16.msra.mxu1 %v3932_v30  ;;  %3608 = vmatmul.mubr.bf16.gmra.mrb[8].mxu0 %v4472_v8  ;;  %v2677_v20 = vunpack.c.l.bf16 %v3202_v6 }
  0x80   : > { %3499 = vmatprep.subr.bf16.mxu1 %v3935_v55  ;;  %3624 = vmatpush3.bf16.msra.mxu0 %v3931_v57 }
  0x81   : > { %3611 = vmatprep.mubr.bf16.mxu0 %v4477_v14  ;;  %3625 = vmatprep.subr.bf16.mxu0 %v3933_v33 }
  0x82   : > { %3484 = vmatmul.mubr.bf16.gmra.mrb[12].mxu1 %v3934_v59  ;;  %v3200_v59 = vld [vmem:[%s4080_s28 + $0xc] sm:$0xff]  }
  0x83   : > { %3500 = vmatpush3.bf16.msra.mxu1 %v3935_v55  ;;  %3503 = vmatprep.mubr.bf16.mxu1 %v3042_v13  ;;  %v2676_v13 = vunpack.c.h.bf16 %v3200_v59 }
  0x84   : > { %3501 = vmatprep.subr.bf16.mxu1 %v3937_v12  ;;  %3626 = vmatpush3.bf16.msra.mxu0 %v3933_v33 }
  0x85   : > { %3627 = vmatprep.subr.bf16.mxu0 %v3936_v7 }
  0x87   : > { %3502 = vmatpush3.bf16.msra.mxu1 %v3937_v12  ;;  %3612 = vmatmul.mubr.bf16.gmra.mrb[12].mxu0 %v4494_v52  ;;  %v2675_v12 = vunpack.c.l.bf16 %v3200_v59 }
  0x88   : > { %3679 = vmatprep.subr.bf16.mxu1 %v3939_v19  ;;  %3628 = vmatpush3.bf16.msra.mxu0 %v3936_v7 }
  0x89   : > { %3631 = vmatprep.mubr.bf16.mxu0 %v4392_v63  ;;  %3629 = vmatprep.subr.bf16.mxu0 %v3938_v23  ;;  %v3945_v63 = vld [vmem:[%s4724_s1 + $0x230] sm:$0xff]  }
  0x8a   : > { %3504 = vmatmul.mubr.bf16.vlgmr.msra.gmra.mrb[0].mxu1 %v4117_v51  ;;  %v3942_v51 = vld [vmem:[%s4724_s1 + $0x218] sm:$0xff]  }
  0x8b   : > { %3687 = vmatpush3.bf16.msra.mxu1 %v3939_v19  ;;  %3507 = vmatprep.mubr.bf16.mxu1 %v4139_v10  ;;  %v3943_v10 = vld [vmem:[%s4724_s1 + $0x220] sm:$0xff]  }
  0x8c   : > { %3680 = vmatprep.subr.bf16.mxu1 %v3940_v21  ;;  %3630 = vmatpush3.bf16.msra.mxu0 %v3938_v23  ;;  %v2773_v23 = vrot.slane %v3238_v5, 1 }
  0x8d   : > { %3647 = vmatprep.subr.bf16.mxu0 %v3939_v19 }
  0x8f   : > { %3688 = vmatpush3.bf16.msra.mxu1 %v3940_v21  ;;  %3632 = vmatmul.mubr.bf16.vlgmr.msra.gmra.mrb[0].mxu0 %v4397_v3 }
  0x90   : > { %3681 = vmatprep.subr.bf16.mxu1 %v3941_v22  ;;  %3648 = vmatpush3.bf16.msra.mxu0 %v3939_v19  ;;  %v2752_v19 = vrot.slane %v3229_v0, 1 }
  0x91   : > { %3635 = vmatprep.mubr.bf16.mxu0 %v4437_v37  ;;  %3649 = vmatprep.subr.bf16.mxu0 %v3940_v21 }
  0x92   : > { %3508 = vmatmul.mubr.bf16.gmra.mrb[4].mxu1 %v4169_v39  ;;  %v3944_v39 = vld [vmem:[%s4724_s1 + $0x228] sm:$0xff]  }
  0x93   : > { %3689 = vmatpush3.bf16.msra.mxu1 %v3941_v22  ;;  %3511 = vmatprep.mubr.bf16.mxu1 %v4187_v61  ;;  %v1856_v61 = vld [vmem:[%s4080_s28 + $0x64] sm:$0xf] }
  0x94   : > { %3682 = vmatprep.subr.bf16.mxu1 %v3942_v51  ;;  %3650 = vmatpush3.bf16.msra.mxu0 %v3940_v21  ;;  %v2191_v24 = vrot.slane %v1856_v61, 5  ;;  %v2772_v21 = vrot.slane %v3237_v4, 1  ;;  %v2748_v61 = vrot.slane %v2676_v13, 1  ;;  %v3220_v13 = vld [vmem:[%s4080_s28 + $0x5c] sm:$0x1] }
  0x95   : > { %3651 = vmatprep.subr.bf16.mxu0 %v3941_v22 }
  0x96   : > { %v2193_v30 = vrot.slane %v2191_v24, 4  ;;  %v2192_v38 = vsel %vm4328_vm5, %v3148_v29, %v2191_v24  ;;  %v3246_v24 = vld [vmem:[%s4080_s28 + $0x60] sm:$0xff]   ;;  %v2755_v29 = vrot.slane %v2680_v16, 1 }
  0x97   : > { %3690 = vmatpush3.bf16.msra.mxu1 %v3942_v51  ;;  %3636 = vmatmul.mubr.bf16.gmra.mrb[4].mxu0 %v4442_v47 }
  0x98   : > { %3683 = vmatprep.subr.bf16.mxu1 %v3943_v10  ;;  %3652 = vmatpush3.bf16.msra.mxu0 %v3941_v22  ;;  %v2195_v40 = vsel %vm4328_vm5, %v2193_v30, %v2194_v31  ;;  %v3244_v22 = vld [vmem:[%s4080_s28 + $0x30] sm:$0xff]   ;;  %v2775_v30 = vrot.slane %v2692_v17, 1 }
  0x99   : > { %3639 = vmatprep.mubr.bf16.mxu0 %v4472_v8  ;;  %3653 = vmatprep.subr.bf16.mxu0 %v3942_v51  ;;  %v3165_v43 = vcombine.low %v2192_v38, %v2195_v40  ;;  %v3233_v38 = vunpack.c.l.bf16 %v3244_v22 }
  0x9a   : > { %3512 = vmatmul.mubr.bf16.gmra.mrb[8].mxu1 %v4212_v26  ;;  %v3946_v26 = vld [vmem:[%s4724_s1 + $0x238] sm:$0xff]  }
  0x9b   : > { %3691 = vmatpush3.bf16.msra.mxu1 %v3943_v10  ;;  %3515 = vmatprep.mubr.bf16.mxu1 %v4233_v53  ;;  %v1859_v53 = vld [vmem:[%s4080_s28 + $0x70] sm:$0xf]  ;;  %v4625_v58 = vrot.slane %v3233_v38, 1 }
  0x9c   : > { %3684 = vmatprep.subr.bf16.mxu1 %v3944_v39  ;;  %3654 = vmatpush3.bf16.msra.mxu0 %v3942_v51  ;;  %v2415_v32 = vrot.slane %v1859_v53, 5  ;;  %v2768_v53 = vrot.slane %v2688_v15, 1 }
  0x9d   : > { %3655 = vmatprep.subr.bf16.mxu0 %v3943_v10 }
  0x9e   : > { %v2417_v41 = vrot.slane %v2415_v32, 4 }
  0x9f   : > { %3692 = vmatpush3.bf16.msra.mxu1 %v3944_v39  ;;  %3640 = vmatmul.mubr.bf16.gmra.mrb[8].mxu0 %v4477_v14 }
  0xa0   : > { %3685 = vmatprep.subr.bf16.mxu1 %v3945_v63  ;;  %3656 = vmatpush3.bf16.msra.mxu0 %v3943_v10  ;;  %v2419_v46 = vsel %vm4328_vm5, %v2417_v41, %v2418_v42  ;;  %v3234_v41 = vunpack.c.h.bf16 %v3244_v22  ;;  %v3241_v42 = vunpack.c.l.bf16 %v3246_v24 }
  0xa1   : > { %3643 = vmatprep.mubr.bf16.mxu0 %v4494_v52  ;;  %3657 = vmatprep.subr.bf16.mxu0 %v3944_v39 }
  0xa2   : > { %3516 = vmatmul.mubr.bf16.gmra.mrb[12].mxu1 %v4254_v18  ;;  %v3174_v18 = vrot.slane %v1858_v35, 9  ;;  %v2750_v35 = vrot.slane %v2677_v20, 1  ;;  %v4628_v6 = vrot.slane %v3234_v41, 1  ;;  %v4650_v41 = vld [vmem:[%s4080_s28 + $0x2c] sm:$0x1] }
  0xa3   : > { %3693 = vmatpush3.bf16.msra.mxu1 %v3945_v63  ;;  %3671 = vmatprep.mubr.bf16.mxu1 %v4477_v14  ;;  %v2687_v14 = vunpack.c.l.bf16 %v3212_v60  ;;  %v2776_v60 = vsel %vm2746_vm6, %v2773_v23, %v2775_v30 }
  0xa4   : > { %3686 = vmatprep.subr.bf16.mxu1 %v3946_v26  ;;  %3658 = vmatpush3.bf16.msra.mxu0 %v3944_v39  ;;  %v2416_v45 = vsel %vm4328_vm5, %v3174_v18, %v2415_v32  ;;  %v2747_v39 = vrot.slane %v2675_v12, 1  ;;  %v4622_v0 = vsel %vm2746_vm6, %v2748_v61, %v2750_v35 }
  0xa5   : > { %3659 = vmatprep.subr.bf16.mxu0 %v3945_v63  ;;  %v3191_v48 = vcombine.low %v2416_v45, %v2419_v46  ;;  %v3242_v46 = vunpack.c.h.bf16 %v3246_v24 }
  0xa7   : > { %3694 = vmatpush3.bf16.msra.mxu1 %v3946_v26  ;;  %3644 = vmatmul.mubr.bf16.gmra.mrb[12].mxu0 %v3165_v43  ;;  %v2783_v17 = vrot.slane %v3242_v46, 1 }
  0xa8   : > { %3660 = vmatpush3.bf16.msra.mxu0 %v3945_v63  ;;  %3663 = vmatprep.mubr.bf16.mxu0 %v4397_v3  ;;  %v2767_v63 = vrot.slane %v2687_v14, 1 }
  0xa9   : > { %3661 = vmatprep.subr.bf16.mxu0 %v3946_v26 }
  0xaa   : > { %3672 = vmatmul.mubr.bf16.vlgmr.msra.gmra.mrb[16].mxu1 %v4494_v52  ;;  %v2753_v52 = vrot.slane %v3230_v2, 1  ;;  %v2769_v56 = vsel %vm2746_vm6, %v2767_v63, %v2768_v53  ;;  %v3223_v2 = vld [vmem:[%s4080_s28 + $0x68] sm:$0x1] }
  0xab   : > { %3675 = vmatprep.mubr.bf16.mxu1 %v3165_v43 }
  0xac   : > { %3662 = vmatpush3.bf16.msra.mxu0 %v3946_v26  ;;  %v4599_v45 = vsel %vm2746_vm6, %v2752_v19, %v2753_v52  ;;  %v2681_v19 = vunpack.c.l.bf16 %v4611_v62 }
  0xae   : > { %v4652_v46 = vrot.slane %v2681_v19, 1 }
  0xaf   : > { %3664 = vmatmul.mubr.bf16.vlgmr.msra.gmra.mrb[0].mxu0 %v4437_v37 }
  0xb0   : > { %3667 = vmatprep.mubr.bf16.mxu0 %v4442_v47 }
  0xb2   : > { %3676 = vmatmul.mubr.bf16.gmra.mrb[20].mxu1 %v3191_v48  ;;  %v3218_v48 = vld [vmem:[%s4080_s28 + $0x54] sm:$0xff]  }
  0xb3   : > { %v2693_v12 = vunpack.c.l.bf16 %v3218_v48  ;;  %v2694_v20 = vunpack.c.h.bf16 %v3218_v48 }
  0xb5   : > { %v2777_v30 = vrot.slane %v2693_v12, 1  ;;  %v2778_v35 = vrot.slane %v2694_v20, 1 }
  0xb7   : > { %3668 = vmatmul.mubr.bf16.gmra.mrb[4].mxu0 %v4472_v8  ;;  %v3214_v8 = vld [vmem:[%s4080_s28 + $0x44] sm:$0x1] }
  0xb8   : > { %v2689_v11 = vunpack.c.l.bf16 %v3214_v8  ;;  %v2782_v8 = vrot.slane %v3241_v42, 1 }
  0xba   : > { %v2770_v36 = vrot.slane %v2689_v11, 1 }
  0xbc   : > { %v2771_v1 = vsel %vm2746_vm6, %v2768_v53, %v2770_v36  ;;  %v4646_v36 = vld [vmem:[%s4080_s28 + $0x38] sm:$0x1] }
 0x15d   : > { %v4555_v9 = vpop.f32.mrb[0].mxu1 }
 0x15e   : > { %v4557_v49 = vpop.f32.mrb[1].mxu1 }
 0x15f   : > { %v4559_v3 = vpop.f32.mrb[2].mxu1 }
 0x160   : > { %v4561_v27 = vpop.f32.mrb[3].mxu1 }
 0x165   : > { %v4563_v50 = vpop.f32.mrb[4].mxu1 }
 0x166   : > { %v4565_v37 = vpop.f32.mrb[5].mxu1 }
 0x167   : > { %v4567_v34 = vpop.f32.mrb[6].mxu1 }
 0x168   : > { %v4569_v47 = vpop.f32.mrb[7].mxu1 }
 0x16d   : > { %v3513_v54 = vpop.f32.mrb[8].mxu1 }
 0x16e   : > { %v1276_v55 = vpop.f32.mrb[9].mxu1 }
 0x16f   : > { %v3514_v44 = vpop.f32.mrb[10].mxu1 }
 0x170   : > { %v1279_v57 = vpop.f32.mrb[11].mxu1 }
 0x172   : > { %v3641_v51 = vpop.f32.mrb[8].mxu0 }
 0x173   : > { %v3703_v25 = vadd.f32 %v3641_v51, %v3513_v54  ;;  %v2331_v28 = vpop.f32.mrb[9].mxu0  ;;  %v2774_v54 = vsel %vm2746_vm6, %v2772_v21, %v2773_v23  ;;  %v2698_v51 = vunpack.c.l.bf16 %v3223_v2 }
 0x174   : > { %v3705_v31 = vadd.f32 %v2331_v28, %v1276_v55  ;;  %v3642_v32 = vpop.f32.mrb[10].mxu0  ;;  %v4604_v55 = vsel %vm2746_vm6, %v2747_v39, %v2748_v61 }
 0x175   : > { %v4584_v33 = vpop.f32.mrb[12].mxu1  ;;  %v3707_v40 = vadd.f32 %v3642_v32, %v3514_v44  ;;  %v2334_v18 = vpop.f32.mrb[11].mxu0  ;;  %v4608_v44 = vsel %vm2746_vm6, %v2753_v52, %v2755_v29 }
 0x176   : > { %v4590_v7 = vpop.f32.mrb[13].mxu1  ;;  %v3709_v43 = vadd.f32 %v2334_v18, %v1279_v57  ;;  %v4618_v57 = vld [vmem:[%s4725_s2] ss:$0 sm:$0xff]  ;;  %v2785_v18 = vrot.slane %v2698_v51, 1 }
 0x177   : > { %v4593_v10 = vpop.f32.mrb[14].mxu1 }
 0x178   : > { %v1295_v26 = vpop.f32.mrb[15].mxu1  ;;  %v2786_v19 = vsel %vm2746_vm6, %v2783_v17, %v2785_v18 }
 0x17a   : > { %v3645_v14 = vpop.f32.mrb[12].mxu0 }
 0x17b   : > { %v3711_v11 = vadd.f32 %v3645_v14, %v4584_v33  ;;  %v2347_v52 = vpop.f32.mrb[13].mxu0 }
 0x17c   : > { %v3713_v39 = vadd.f32 %v2347_v52, %v4590_v7  ;;  %v3646_v61 = vpop.f32.mrb[14].mxu0 }
 0x17d   : > { %v3673_v59 = vpop.f32.mrb[16].mxu1  ;;  %v3715_v28 = vadd.f32 %v3646_v61, %v4593_v10  ;;  %v2350_v53 = vpop.f32.mrb[15].mxu0 }
 0x17e   : > { %v3704_v4 = vadd.f32 %v3703_v25, %v3673_v59  ;;  %v2555_v5 = vpop.f32.mrb[17].mxu1  ;;  %v2695_v25 = vunpack.c.l.bf16 %v3220_v13  ;;  %v2784_v59 = vsel %vm2746_vm6, %v2782_v8, %v2783_v17  ;;  %v2683_v13 = vunpack.c.l.bf16 %v4650_v41 }
 0x17f   : > { %v3706_v15 = vadd.f32 %v3705_v31, %v2555_v5  ;;  %v3674_v16 = vpop.f32.mrb[18].mxu1  ;;  %v3717_v31 = vadd.f32 %v2350_v53, %v1295_v26 }
 0x180   : > { %v2716_v21 = vadd.f32 %v3704_v4, %v4618_v57  ;;  %v3708_v23 = vadd.f32 %v3707_v40, %v3674_v16  ;;  %v2558_v22 = vpop.f32.mrb[19].mxu1  ;;  %v2682_v40 = vunpack.c.h.bf16 %v4611_v62  ;;  %v2780_v48 = vrot.slane %v2695_v25, 1 }
 0x181   : > { %v2714_v63 = vadd.f32 %v3706_v15, %v4618_v57  ;;  %v3710_v24 = vadd.f32 %v3709_v43, %v2558_v22 }
 0x182   : > { %v2813_v33 = vadd.f32 %v2774_v54, %v2716_v21  ;;  %v2717_v29 = vadd.f32 %v3708_v23, %v4618_v57  ;;  %v3665_v4 = vpop.f32.mrb[0].mxu0  ;;  %v2781_v22 = vsel %vm2746_vm6, %v2778_v35, %v2780_v48 }
 0x183   : > { %v2811_v7 = vadd.f32 %v2769_v56, %v2714_v63  ;;  %v2715_v32 = vadd.f32 %v3710_v24, %v4618_v57  ;;  %v3695_v14 = vadd.f32 %v3665_v4, %v4555_v9  ;;  %v2523_v15 = vpop.f32.mrb[1].mxu0 }
 0x184   : > { %v2829_v38 = vmax.f32 %v2813_v33, 0.0  ;;  %v2814_v10 = vadd.f32 %v2776_v60, %v2717_v29  ;;  %v2686_v60 = vunpack.c.l.bf16 %v4646_v36  ;;  %v3666_v52 = vpop.f32.mrb[2].mxu0 }
 0x185   : > { %v2827_v26 = vmax.f32 %v2811_v7, 0.0  ;;  %v2812_v42 = vadd.f32 %v2771_v1, %v2715_v32  ;;  %v3677_v43 = vpop.f32.mrb[20].mxu1  ;;  %v2779_v1 = vsel %vm2746_vm6, %v2777_v30, %v2778_v35  ;;  %v2708_v51 = vadd.f32 %v3695_v14, %v4618_v57 }
 0x186   : > { %2845 = vst [vmem:[%s4642_s25 + $0x50] sm:$0xff] %v2829_v38  ;;  %v2830_v54 = vmax.f32 %v2814_v10, 0.0  ;;  %v3712_v56 = vadd.f32 %v3711_v11, %v3677_v43  ;;  %v2571_v2 = vpop.f32.mrb[21].mxu1  ;;  %v3696_v11 = vadd.f32 %v2523_v15, %v4557_v49  ;;  %v3697_v9 = vadd.f32 %v3666_v52, %v4559_v3 }
 0x187   : > { %2843 = vst [vmem:[%s4642_s25 + $0x40] sm:$0xff] %v2827_v26  ;;  %v2828_v62 = vmax.f32 %v2812_v42, 0.0  ;;  %v3714_v5 = vadd.f32 %v3713_v39, %v2571_v2  ;;  %v3678_v12 = vpop.f32.mrb[22].mxu1  ;;  %v2526_v39 = vpop.f32.mrb[3].mxu0  ;;  %v2758_v35 = vrot.slane %v2682_v40, 1 }
 0x188   : > { %2846 = vst [vmem:[%s4642_s25 + $0x58] sm:$0xff] %v2830_v54  ;;  %v2720_v16 = vadd.f32 %v3712_v56, %v4618_v57  ;;  %v3716_v8 = vadd.f32 %v3715_v28, %v3678_v12  ;;  %v2574_v20 = vpop.f32.mrb[23].mxu1  ;;  %v2706_v17 = vadd.f32 %v3696_v11, %v4618_v57  ;;  %v3698_v49 = vadd.f32 %v2526_v39, %v4561_v27 }
 0x189   : > { %2844 = vst [vmem:[%s4642_s25 + $0x48] sm:$0xff] %v2828_v62  ;;  %v2718_v21 = vadd.f32 %v3714_v5, %v4618_v57  ;;  %v3718_v23 = vadd.f32 %v3717_v31, %v2574_v20  ;;  %v2805_v28 = vadd.f32 %v4599_v45, %v2708_v51  ;;  %v2709_v53 = vadd.f32 %v3697_v9, %v4618_v57 }
 0x18a   : > { %v2817_v61 = vadd.f32 %v2784_v59, %v2720_v16  ;;  %v2721_v63 = vadd.f32 %v3716_v8, %v4618_v57  ;;  %v2803_v3 = vadd.f32 %v4604_v55, %v2706_v17  ;;  %v2707_v30 = vadd.f32 %v3698_v49, %v4618_v57  ;;  %v3669_v10 = vpop.f32.mrb[4].mxu0 }
 0x18b   : > { %v2815_v24 = vadd.f32 %v2779_v1, %v2718_v21  ;;  %v2719_v25 = vadd.f32 %v3718_v23, %v4618_v57  ;;  %v2821_v32 = vmax.f32 %v2805_v28, 0.0  ;;  %v2806_v27 = vadd.f32 %v4608_v44, %v2709_v53  ;;  %v2539_v42 = vpop.f32.mrb[5].mxu0 }
 0x18c   : > { %v2833_v33 = vmax.f32 %v2817_v61, 0.0  ;;  %v2818_v29 = vadd.f32 %v2786_v19, %v2721_v63  ;;  %v2819_v36 = vmax.f32 %v2803_v3, 0.0  ;;  %v2804_v38 = vadd.f32 %v4622_v0, %v2707_v30  ;;  %v3670_v48 = vpop.f32.mrb[6].mxu0 }
 0x18d   : > { %v2831_v31 = vmax.f32 %v2815_v24, 0.0  ;;  %v2816_v7 = vadd.f32 %v2781_v22, %v2719_v25  ;;  %v2765_v55 = vrot.slane %v2686_v60, 1  ;;  %2837 = vst [vmem:[%s4642_s25 + $0x10] sm:$0xff] %v2821_v32  ;;  %v2822_v41 = vmax.f32 %v2806_v27, 0.0  ;;  %v2542_v59 = vpop.f32.mrb[7].mxu0 }
 0x18e   : > { %2849 = vst [vmem:[%s4642_s25 + $0x70] sm:$0xff] %v2833_v33  ;;  %v2834_v45 = vmax.f32 %v2818_v29, 0.0  ;;  %v3699_v26 = vadd.f32 %v3669_v10, %v4563_v50  ;;  %v2760_v44 = vrot.slane %v2683_v13, 1  ;;  %2835 = vst [vmem:[%s4642_s25] sm:$0xff] %v2819_v36  ;;  %v2820_v40 = vmax.f32 %v2804_v38, 0.0 }
 0x18f   : > { %2847 = vst [vmem:[%s4642_s25 + $0x60] sm:$0xff] %v2831_v31  ;;  %v2832_v18 = vmax.f32 %v2816_v7, 0.0  ;;  %v2764_v0 = vsel %vm2746_vm6, %v4625_v58, %v4628_v6  ;;  %v3700_v43 = vadd.f32 %v2539_v42, %v4565_v37  ;;  %2838 = vst [vmem:[%s4642_s25 + $0x18] sm:$0xff] %v2822_v41  ;;  %v2759_v56 = vsel %vm2746_vm6, %v4652_v46, %v2758_v35 }
 0x190   : > { %2850 = vst [vmem:[%s4642_s25 + $0x78] sm:$0xff] %v2834_v45  ;;  %v2712_v54 = vadd.f32 %v3699_v26, %v4618_v57  ;;  %v3701_v50 = vadd.f32 %v3670_v48, %v4567_v34  ;;  %2836 = vst [vmem:[%s4642_s25 + $0x8] sm:$0xff] %v2820_v40  ;;  %v2766_v37 = vsel %vm2746_vm6, %v4628_v6, %v2765_v55 }
 0x191   : > { %2848 = vst [vmem:[%s4642_s25 + $0x68] sm:$0xff] %v2832_v18  ;;  %v2710_v2 = vadd.f32 %v3700_v43, %v4618_v57  ;;  %v3702_v58 = vadd.f32 %v2542_v59, %v4569_v47  ;;  %v2761_v46 = vsel %vm2746_vm6, %v2758_v35, %v2760_v44 }
 0x192   : > { %v2809_v60 = vadd.f32 %v2764_v0, %v2712_v54  ;;  %v2713_v4 = vadd.f32 %v3701_v50, %v4618_v57 }
 0x193   : > { %v2807_v62 = vadd.f32 %v2759_v56, %v2710_v2  ;;  %v2711_v34 = vadd.f32 %v3702_v58, %v4618_v57 }
 0x194   : > { %v2825_v5 = vmax.f32 %v2809_v60, 0.0  ;;  %v2810_v1 = vadd.f32 %v2766_v37, %v2713_v4 }
 0x195   : > { %v2823_v12 = vmax.f32 %v2807_v62, 0.0  ;;  %v2808_v13 = vadd.f32 %v2761_v46, %v2711_v34 }
 0x196   : > { %2841 = vst [vmem:[%s4642_s25 + $0x30] sm:$0xff] %v2825_v5  ;;  %v2826_v14 = vmax.f32 %v2810_v1, 0.0 }
 0x197   : > { %2839 = vst [vmem:[%s4642_s25 + $0x20] sm:$0xff] %v2823_v12  ;;  %v2824_v15 = vmax.f32 %v2808_v13, 0.0 }
 0x198   : > { %2842 = vst [vmem:[%s4642_s25 + $0x38] sm:$0xff] %v2826_v14 }
 0x199   : > { %2840 = vst [vmem:[%s4642_s25 + $0x28] sm:$0xff] %v2824_v15 }
 0x19a PF: > { %s13_s16 = sadd.s32 1, %s3985_s16   ;;  %s4732_s12 = smov %s3977_s14 }
 0x19b   : > { %p10_p8 = scmp.ge.s32.totalorder %s13_s16, 6   ;;  %s4733_s13 = smov %s3981_s15 }
 0x19c   : > { %s4734_s14 = smov %s4737_s17  ;;  %s4735_s15 = smov %s4741_s18 }
 0x19d   :  { %12 = sbr.rel (!%p10_p8) target bundleno = 3 (0x3), region = 71 }

</bundles_post_ra>
